<compile_context>
chip_gen: v6e
topology: v6e:2x2x1
jax: 0.10.0
libtpu: 0.0.40
codegen_flags: <defaults>
</compile_context>

<pallas_src>
import numpy as np

import jax
import jax.numpy as jnp
from jax.experimental import pallas as pl
from jax.experimental.pallas import tpu as pltpu


def _round_up(x, m):
    return (x + m - 1) // m * m


def _unrolled_conv_operator(w, b, hin, win, stride, input_order, scale=1.0):
    """Dense (S_in, S_out) operator equivalent to VALID Conv2d + bias.

    input_order: 'HWC' (flattened raw NHWC obs) or 'CHW' (previous layer's
    output order == torch NCHW flatten order).  Output order is always 'CHW',
    so the last layer's output equals nn.Flatten of the torch activations.
    `scale` (e.g. 1/255) is folded into the weights (not the bias).
    """
    cout, cin, kh, kw = w.shape
    oh = (hin - kh) // stride + 1
    ow = (win - kw) // stride + 1
    s_in = cin * hin * win
    s_out = cout * oh * ow
    mat = np.zeros((s_in, s_out), np.float32)
    for co in range(cout):
        for oy in range(oh):
            for ox in range(ow):
                q_out = (co * oh + oy) * ow + ox
                for ci in range(cin):
                    for p in range(kh):
                        for q in range(kw):
                            iy = oy * stride + p
                            ix = ox * stride + q
                            if input_order == "HWC":
                                q_in = (iy * win + ix) * cin + ci
                            else:  # CHW
                                q_in = (ci * hin + iy) * win + ix
                            mat[q_in, q_out] = w[co, ci, p, q]
    bias_flat = np.repeat(np.asarray(b, np.float32), oh * ow).reshape(1, s_out)
    return mat * float(scale), bias_flat, oh, ow


def _const_block_spec(shape):
    """Block-invariant operand: full block, constant index_map, single buffer.

    The data is DMA'd into VMEM exactly once, so a second pipeline buffer is
    pure VMEM waste (matters most on v7x's 64 MiB VMEM / larger operators).
    Falls back to default buffering on jax versions without pipeline_mode.
    """
    try:
        return pl.BlockSpec(shape, lambda i: (0, 0), pipeline_mode=pl.Buffered(1))
    except TypeError:
        return pl.BlockSpec(shape, lambda i: (0, 0))


def _make_encoder_kernel(num_layers):
    """Fused kernel: uint8 -> bf16 cast -> (MXU matmul + bias + ReLU) * L -> store."""

    def kernel(*refs):
        obs_ref = refs[0]
        out_ref = refs[-1]
        # uint8 values 0..255 are exact in bf16; the 1/255 scale lives in W_0.
        x = obs_ref[...].astype(jnp.bfloat16)
        for l in range(num_layers):
            w_ref = refs[1 + 2 * l]
            b_ref = refs[2 + 2 * l]
            y = jnp.dot(x, w_ref[...], preferred_element_type=jnp.float32)
            y = jnp.maximum(y + b_ref[...], 0.0)       # f32 bias + ReLU
            # bf16 operand for the next MXU pass (== default-precision rounding).
            x = y.astype(jnp.bfloat16) if l + 1 < num_layers else y
        out_ref[...] = x.astype(out_ref.dtype)

    return kernel


class SCMEncoderPallas:
    """JAX/Pallas port of SCMEncoder.

    input_shape : (H, W, C) of the observation (NHWC, gym-style).
    conv_filters: list of [out_channels, [kh, kw], stride].
    activation  : 'relu'.
    """

    def __init__(self, input_shape, conv_filters, activation="relu", key=None):
        assert activation == "relu", "only relu activation implemented"
        if key is None:
            key = jax.random.PRNGKey(0)
        H, W, C = input_shape
        self.input_shape = (H, W, C)
        self.params = []   # original (weight OIHW, bias, stride) -- reference/export
        self.mats = []     # per-layer (bf16 unrolled weight (S_in_pad, S_out_pad), f32 bias)
        in_c, h, w = C, H, W
        prev_pad = H * W * C          # rows of layer-0 operator: unpadded flat obs
        for li, (out_c, (kh, kw), s) in enumerate(conv_filters):
            key, wk, bk = jax.random.split(key, 3)
            fan_in = in_c * kh * kw
            bound = float(1.0 / np.sqrt(fan_in))   # PyTorch Conv2d default init range
            wgt = jax.random.uniform(wk, (out_c, in_c, kh, kw), jnp.float32, -bound, bound)
            bias = jax.random.uniform(bk, (out_c,), jnp.float32, -bound, bound)
            self.params.append((wgt, bias, (s, s)))

            mat, bflat, oh, ow = _unrolled_conv_operator(
                np.asarray(wgt), np.asarray(bias), h, w, s,
                input_order="HWC" if li == 0 else "CHW",
                scale=(1.0 / 255.0) if li == 0 else 1.0)
            s_out = mat.shape[1]
            out_pad = _round_up(s_out, 128)        # lane-dense columns everywhere
            mat_p = np.zeros((prev_pad, out_pad), np.float32)
            mat_p[: mat.shape[0], :s_out] = mat    # extra rows/cols are exact zeros
            b_p = np.zeros((1, out_pad), np.float32)
            b_p[:, :s_out] = bflat
            self.mats.append((jnp.asarray(mat_p, dtype=jnp.bfloat16),
                              jnp.asarray(b_p, dtype=jnp.float32)))
            prev_pad = out_pad
            h, w, in_c = oh, ow, out_c

        self.output_dim = in_c * h * w
        self.padded_output_dim = prev_pad

    def __call__(self, obs_nhwc, *, batch_tile=None):
        H, W, C = self.input_shape
        B = obs_nhwc.shape[0]
        S = H * W * C
        Dp = self.padded_output_dim
        num_layers = len(self.mats)

        # Per-image HWC flattening (free, row-major view). dtype (uint8) kept.
        x2d = obs_nhwc.reshape(B, S)

        # Batch tile: multiple of 32 keeps uint8 blocks on native (32,128)
        # packed tiling; up to 256 rows fills the 256-wide MXU on v6e/v7x and
        # amortizes the ~0.35us fixed cost per grid step.
        if batch_tile is None:
            batch_tile = min(256, _round_up(B, 32))
        b_pad = _round_up(B, batch_tile)
        if b_pad != B:
            x2d = jnp.pad(x2d, ((0, b_pad - B), (0, 0)))

        in_specs = [pl.BlockSpec((batch_tile, S), lambda i: (i, 0))]
        operands = [x2d]
        for mat, bflat in self.mats:
            in_specs.append(_const_block_spec(mat.shape))
            in_specs.append(_const_block_spec(bflat.shape))
            operands += [mat, bflat]

        flops = 2 * b_pad * sum(int(m.shape[0]) * int(m.shape[1]) for m, _ in self.mats)
        bytes_accessed = int(
            b_pad * S                                                     # uint8 obs in
            + sum(m.size * m.dtype.itemsize + bf.size * bf.dtype.itemsize
                  for m, bf in self.mats)                                 # operators (once)
            + b_pad * Dp * 4)                                             # f32 features out

        out = pl.pallas_call(
            _make_encoder_kernel(num_layers),
            out_shape=jax.ShapeDtypeStruct((b_pad, Dp), jnp.float32),
            grid=(b_pad // batch_tile,),
            in_specs=in_specs,
            out_specs=pl.BlockSpec((batch_tile, Dp), lambda i: (i, 0)),
            compiler_params=pltpu.CompilerParams(
                dimension_semantics=("parallel",),
                vmem_limit_bytes=32 * 1024 * 1024),
            cost_estimate=pl.CostEstimate(
                flops=flops, transcendentals=0, bytes_accessed=bytes_accessed),
        )(*operands)

        # Drop batch padding rows and the zero-padded feature columns.
        return out[:B, : self.output_dim]


def _reference(obs_nhwc, params):
    """Pure-JAX reference (lax.conv) mirroring the PyTorch module."""
    x = jnp.transpose(obs_nhwc.astype(jnp.float32), (0, 3, 1, 2)) / 255.0
    for wgt, b, stride in params:
        x = jax.lax.conv_general_dilated(
            x, wgt, window_strides=stride, padding="VALID",
            dimension_numbers=("NCHW", "OIHW", "NCHW"),
            precision=jax.lax.Precision.HIGHEST)
        x = jnp.maximum(x + b.reshape(1, -1, 1, 1), 0.0)
    return x.reshape(x.shape[0], -1)


if __name__ == "__main__":
    key = jax.random.PRNGKey(0)
    k_obs, k_params = jax.random.split(key)

    B, H, W, C = 2, 16, 16, 4
    conv_filters = [[8, [4, 4], 2], [16, [4, 4], 2]]

    # uint8-style observation in NHWC, as produced by a gym env.
    obs = jax.random.randint(k_obs, (B, H, W, C), 0, 256, dtype=jnp.int32).astype(jnp.uint8)

    enc = SCMEncoderPallas((H, W, C), conv_filters, activation="relu", key=k_params)

    out = jax.block_until_ready(enc(obs))
    ref = _reference(obs, enc.params)

    assert out.shape == (B, enc.output_dim), (out.shape, enc.output_dim)
    # Tolerance covers the bf16 operand path (identical rounding to the MXU's
    # default-precision f32 matmul) vs the HIGHEST-precision XLA conv reference.
    assert jnp.allclose(out, ref, atol=1e-2, rtol=1e-2), float(jnp.max(jnp.abs(out - ref)))

    print("KERNEL_OK")
</pallas_src>

<mosaic_0001>
module attributes {stable_mosaic.version = 11 : i64} {
  func.func @kernel(%arg0: i32, %arg1: memref<32x1024xi8, #tpu.memory_space<vmem>>, %arg2: memref<1024x512xbf16, #tpu.memory_space<vmem>>, %arg3: memref<1x512xf32, #tpu.memory_space<vmem>>, %arg4: memref<512x128xbf16, #tpu.memory_space<vmem>>, %arg5: memref<1x128xf32, #tpu.memory_space<vmem>>, %arg6: memref<32x128xf32, #tpu.memory_space<vmem>>) attributes {dimension_semantics = [#tpu.dimension_semantics<parallel>], iteration_bounds = array<i64: 1>, scalar_prefetch = 0 : i64, scratch_operands = 0 : i64, tpu.core_type = #tpu.core_type<tc>, window_params = [{transform_indices = @transform_0, window_bounds = array<i64: 32, 1024>}, {pipeline_mode = #tpu.pipeline_mode<synchronous>, transform_indices = @transform_1, window_bounds = array<i64: 1024, 512>}, {pipeline_mode = #tpu.pipeline_mode<synchronous>, transform_indices = @transform_2, window_bounds = array<i64: 1, 512>}, {pipeline_mode = #tpu.pipeline_mode<synchronous>, transform_indices = @transform_3, window_bounds = array<i64: 512, 128>}, {pipeline_mode = #tpu.pipeline_mode<synchronous>, transform_indices = @transform_4, window_bounds = array<i64: 1, 128>}, {transform_indices = @transform_5, window_bounds = array<i64: 32, 128>}]} {
    %c0 = arith.constant 0 : index
    %c0_0 = arith.constant 0 : index
    %0 = vector.load %arg1[%c0, %c0_0] : memref<32x1024xi8, #tpu.memory_space<vmem>>, vector<32x1024xi8>
    %1 = arith.uitofp %0 : vector<32x1024xi8> to vector<32x1024xbf16>
    %c0_1 = arith.constant 0 : index
    %c0_2 = arith.constant 0 : index
    %2 = vector.load %arg2[%c0_1, %c0_2] : memref<1024x512xbf16, #tpu.memory_space<vmem>>, vector<1024x512xbf16>
    %cst = arith.constant dense<0.000000e+00> : vector<32x512xf32>
    %3 = tpu.matmul %1, %2, %cst {dimension_numbers = #tpu.dot_dimension_numbers<[1], [0], [0], [1], [0, 0, 1, 1], [], []>} : vector<32x1024xbf16>, vector<1024x512xbf16>, vector<32x512xf32> -> vector<32x512xf32>
    %c0_3 = arith.constant 0 : index
    %c0_4 = arith.constant 0 : index
    %4 = vector.load %arg3[%c0_3, %c0_4] : memref<1x512xf32, #tpu.memory_space<vmem>>, vector<1x512xf32>
    %5 = vector.broadcast %4 : vector<1x512xf32> to vector<32x512xf32>
    %6 = arith.addf %3, %5 : vector<32x512xf32>
    %cst_5 = arith.constant 0.000000e+00 : f32
    %7 = vector.broadcast %cst_5 : f32 to vector<32x512xf32>
    %8 = arith.maximumf %6, %7 : vector<32x512xf32>
    %9 = arith.truncf %8 : vector<32x512xf32> to vector<32x512xbf16>
    %c0_6 = arith.constant 0 : index
    %c0_7 = arith.constant 0 : index
    %10 = vector.load %arg4[%c0_6, %c0_7] : memref<512x128xbf16, #tpu.memory_space<vmem>>, vector<512x128xbf16>
    %cst_8 = arith.constant dense<0.000000e+00> : vector<32x128xf32>
    %11 = tpu.matmul %9, %10, %cst_8 {dimension_numbers = #tpu.dot_dimension_numbers<[1], [0], [0], [1], [0, 0, 1, 1], [], []>} : vector<32x512xbf16>, vector<512x128xbf16>, vector<32x128xf32> -> vector<32x128xf32>
    %c0_9 = arith.constant 0 : index
    %c0_10 = arith.constant 0 : index
    %12 = vector.load %arg5[%c0_9, %c0_10] : memref<1x128xf32, #tpu.memory_space<vmem>>, vector<1x128xf32>
    %13 = vector.broadcast %12 : vector<1x128xf32> to vector<32x128xf32>
    %14 = arith.addf %11, %13 : vector<32x128xf32>
    %cst_11 = arith.constant 0.000000e+00 : f32
    %15 = vector.broadcast %cst_11 : f32 to vector<32x128xf32>
    %16 = arith.maximumf %14, %15 : vector<32x128xf32>
    %c0_12 = arith.constant 0 : index
    %c0_13 = arith.constant 0 : index
    %17 = vector.load %arg6[%c0_12, %c0_13] : memref<32x128xf32, #tpu.memory_space<vmem>>, vector<32x128xf32>
    tpu.vector_store %arg6[%c0_12, %c0_13], %16 {strides = array<i32>} : memref<32x128xf32, #tpu.memory_space<vmem>>, vector<32x128xf32>,
    return
  }
  func.func @transform_0(%arg0: i32) -> (i32, i32) {
    %c0_i32 = arith.constant 0 : i32
    %c0_i32_0 = arith.constant 0 : i32
    return %arg0, %c0_i32 : i32, i32
  }
  func.func @transform_1(%arg0: i32) -> (i32, i32) {
    %c0_i32 = arith.constant 0 : i32
    %c0_i32_0 = arith.constant 0 : i32
    %c0_i32_1 = arith.constant 0 : i32
    return %c0_i32, %c0_i32_0 : i32, i32
  }
  func.func @transform_2(%arg0: i32) -> (i32, i32) {
    %c0_i32 = arith.constant 0 : i32
    %c0_i32_0 = arith.constant 0 : i32
    %c0_i32_1 = arith.constant 0 : i32
    return %c0_i32, %c0_i32_0 : i32, i32
  }
  func.func @transform_3(%arg0: i32) -> (i32, i32) {
    %c0_i32 = arith.constant 0 : i32
    %c0_i32_0 = arith.constant 0 : i32
    %c0_i32_1 = arith.constant 0 : i32
    return %c0_i32, %c0_i32_0 : i32, i32
  }
  func.func @transform_4(%arg0: i32) -> (i32, i32) {
    %c0_i32 = arith.constant 0 : i32
    %c0_i32_0 = arith.constant 0 : i32
    %c0_i32_1 = arith.constant 0 : i32
    return %c0_i32, %c0_i32_0 : i32, i32
  }
  func.func @transform_5(%arg0: i32) -> (i32, i32) {
    %c0_i32 = arith.constant 0 : i32
    %c0_i32_0 = arith.constant 0 : i32
    return %arg0, %c0_i32 : i32, i32
  }
}

</mosaic_0001>

<bundles_post_ra>
// kernel: tpu_custom_call.1
= control target key start
LH: loop header
LB: loop body
LE: loop exit
PB: predicated region body
PF: predicated region fallthrough
CT: control target
= control target key end

     0   :  { %10 = vsyncpa [#allocation3], 0  ;;  %s3538_s0 = inlined_call_operand.hbm [shape: u8[32,1024], index: 0, kind: input, shape index: {}]   ;;  %s3539_s1 = inlined_call_operand.hbm [shape: bf16[1024,512], index: 1, kind: input, shape index: {}]   ;;  %s3540_s2 = inlined_call_operand.hbm [shape: f32[1,512], index: 2, kind: input, shape index: {}]   ;;  %s3541_s3 = inlined_call_operand.hbm [shape: bf16[512,128], index: 3, kind: input, shape index: {}]   ;;  %s3542_s4 = inlined_call_operand.vmem [shape: f32[1,128], index: 4, kind: input, shape index: {}]   ;;  %s3543_s5 = inlined_call_operand.hbm [shape: f32[32,128], index: 5, kind: output, shape index: {}]  }
   0x1   :  { %11 = vsyncpa [#allocation6], 0 }
   0x2   :  { %12 = vsyncpa [#allocation9], 0 }
   0x3   :  { %13 = vsyncpa [#allocation4], 0  ;;  %s3371_s18 = smov [#allocation5]  }
   0x4   :  { %s29_s19 = sshll.u32 %s3371_s18, 4  ;;  %s30_s19 = int_to_ptr.vmem [resolvable:$true] %s29_s19 }
   0x5   :  { %s3271_s20 = scalar_lea.vmem %s30_s19, 32768  ;;  %p3276_p1 = scmp.lt.s32.totalorder %s30_s19, %s30_s19 }
   0x6   :  { %p3272_p0 = scmp.ne.s32.totalorder %s30_s19, %s3271_s20  ;;  %p3277_p2 = scmp.lt.s32.totalorder %s3271_s20, %s3271_s20 }
   0x8   :  { %p3278_p3 = por %p3277_p2, %p3276_p1 }
   0xa   :  { %p3279_p4 = pnand %p3278_p3, %p3272_p0 }
   0xc   :  { %3282 = shalt.err (!%p3279_p4)
}
   0xd   :  { %s3372_s21 = smov 256   ;;  %s3373_s22 = smov 16  }
   0xe   :  { %35 = dma.hbm_to_vmem [thread:$0]  %s3539_s1, 32768, %s30_s19, [#allocation6], %s3372_s21, %s3372_s21, %s3373_s22  }
   0xf   :  { %s3374_s25 = smov [#allocation2]   ;;  %s3375_s27 = smov [#allocation7]  }
  0x10   :  { %s20_s26 = sshll.u32 %s3374_s25, 4  ;;  %s42_s28 = sshll.u32 %s3375_s27, 4  ;;  %s21_s26 = int_to_ptr.vmem [resolvable:$true] %s20_s26  ;;  %s43_s28 = int_to_ptr.vmem [resolvable:$true] %s42_s28 }
  0x11   :  { %s3291_s29 = scalar_lea.vmem %s21_s26, 1024  ;;  %p3296_p6 = scmp.lt.s32.totalorder %s21_s26, %s21_s26 }
  0x12   :  { %p3292_p5 = scmp.ne.s32.totalorder %s21_s26, %s3291_s29  ;;  %p3297_p7 = scmp.lt.s32.totalorder %s3291_s29, %s3291_s29 }
  0x14   :  { %p3298_p8 = por %p3297_p7, %p3296_p6 }
  0x16   :  { %p3299_p9 = pnand %p3298_p8, %p3292_p5 }
  0x18   :  { %3302 = shalt.err (!%p3299_p9)
}
  0x19   :  { %23 = dma.hbm_to_vmem [thread:$0]  %s3538_s0, 1024, %s21_s26, [#allocation3]  }
  0x1a   :  { %s3311_s7 = scalar_lea.vmem %s43_s28, 64  ;;  %p3316_p11 = scmp.lt.s32.totalorder %s43_s28, %s43_s28 }
  0x1b   :  { %p3312_p10 = scmp.ne.s32.totalorder %s43_s28, %s3311_s7  ;;  %p3317_p12 = scmp.lt.s32.totalorder %s3311_s7, %s3311_s7 }
  0x1d   :  { %p3318_p13 = por %p3317_p12, %p3316_p11 }
  0x1f   :  { %p3319_p0 = pnand %p3318_p13, %p3312_p10 }
  0x21   :  { %3322 = shalt.err (!%p3319_p0)
}
  0x22   :  { %45 = dma.hbm_to_vmem [thread:$0]  %s3540_s2, 64, %s43_s28, [#allocation6]  }
  0x23   :  { %s3376_s9 = smov [#allocation8]  }
  0x24   :  { %s51_s10 = sshll.u32 %s3376_s9, 4  ;;  %s52_s10 = int_to_ptr.vmem [resolvable:$true] %s51_s10 }
  0x25   :  { %s3331_s11 = scalar_lea.vmem %s52_s10, 4096  ;;  %p3336_p2 = scmp.lt.s32.totalorder %s52_s10, %s52_s10 }
  0x26   :  { %p3332_p1 = scmp.ne.s32.totalorder %s52_s10, %s3331_s11  ;;  %p3337_p3 = scmp.lt.s32.totalorder %s3331_s11, %s3331_s11 }
  0x28   :  { %p3338_p4 = por %p3337_p3, %p3336_p2 }
  0x2a   :  { %p3339_p5 = pnand %p3338_p4, %p3332_p1 }
  0x2c   :  { %3342 = shalt.err (!%p3339_p5)
}
  0x2d   :  { %s3377_s0 = smov 64   ;;  %s3378_s12 = smov 4  }
  0x2e   :  { %57 = dma.hbm_to_vmem [thread:$0]  %s3541_s3, 4096, %s52_s10, [#allocation9], %s3377_s0, %s3377_s0, %s3378_s12  }
  0x2f   :  { %3363 = dma.done.wait [#allocation3], 1024  }
  0x30   :  { %3364 = vsyncadd [#allocation3], 4294966272 }
  0x31   :  { %3365 = dma.done.wait [#allocation6], 32832  }
  0x32   :  { %3366 = vsyncadd [#allocation6], 4294934464 }
  0x33   :  { %3367 = dma.done.wait [#allocation9], 4096  }
  0x34   :  { %3368 = vsyncadd [#allocation9], 4294963200  ;;  %v2847_v0 = vld [vmem:[#allocation5 + $0xe4] ss:$16 sps:$4 sm:$0xff]   ;;  %v2851_v2 = vld [vmem:[#allocation5 + $0xe0] ss:$16 sps:$4 sm:$0xff]  }
  0x35   :  { %v2849_v1 = vld [vmem:[#allocation5 + $0x2e4] ss:$16 sps:$4 sm:$0xff]   ;;  %1655 = vmatprep.subr.bf16.mxu0 %v2847_v0  ;;  %v2852_v3 = vld [vmem:[#allocation5 + $0x2e0] ss:$16 sps:$4 sm:$0xff]   ;;  %v3424_v46 = vld [vmem:[#allocation2 + $0x8] sm:$0xff] }
  0x36   :  { %1708 = vmatprep.subr.bf16.mxu1 %v2849_v1  ;;  %v2853_v4 = vld [vmem:[#allocation5 + $0xc4] ss:$16 sps:$4 sm:$0xff]   ;;  %1656 = vmatpush1.bf16.msra.mxu0 %v2851_v2  ;;  %v2857_v6 = vld [vmem:[#allocation5 + $0xc0] ss:$16 sps:$4 sm:$0xff]   ;;  %v82_v49 = vunpack.c.l.u8.bf16 %v3424_v46  ;;  %v3427_v50 = vld [vmem:[#allocation2 + $0x18] sm:$0xff] }
  0x37   :  { %1709 = vmatpush1.bf16.msra.mxu1 %v2852_v3  ;;  %v2855_v5 = vld [vmem:[#allocation5 + $0x2c4] ss:$16 sps:$4 sm:$0xff]   ;;  %1657 = vmatprep.subr.bf16.mxu0 %v2853_v4  ;;  %v2858_v7 = vld [vmem:[#allocation5 + $0x2c0] ss:$16 sps:$4 sm:$0xff]   ;;  %v84_v52 = vunpack.c.l.u8.bf16 %v3427_v50 }
  0x38   :  { %1710 = vmatprep.subr.bf16.mxu1 %v2855_v5  ;;  %v2859_v8 = vld [vmem:[#allocation5 + $0xa4] ss:$16 sps:$4 sm:$0xff]   ;;  %v2863_v10 = vld [vmem:[#allocation5 + $0xa0] ss:$16 sps:$4 sm:$0xff]   ;;  %1687 = vmatprep.mubr.bf16.mxu0 %v82_v49 }
  0x39   :  { %v2861_v9 = vld [vmem:[#allocation5 + $0x2a4] ss:$16 sps:$4 sm:$0xff]   ;;  %v2864_v11 = vld [vmem:[#allocation5 + $0x2a0] ss:$16 sps:$4 sm:$0xff]   ;;  %1740 = vmatprep.mubr.bf16.mxu1 %v84_v52 }
  0x3a   :  { %1658 = vmatpush1.bf16.msra.mxu0 %v2857_v6  ;;  %v2865_v12 = vld [vmem:[#allocation5 + $0x84] ss:$16 sps:$4 sm:$0xff]   ;;  %v2869_v14 = vld [vmem:[#allocation5 + $0x80] ss:$16 sps:$4 sm:$0xff]  }
  0x3b   :  { %1711 = vmatpush1.bf16.msra.mxu1 %v2858_v7  ;;  %1659 = vmatprep.subr.bf16.mxu0 %v2859_v8  ;;  %v2867_v13 = vld [vmem:[#allocation5 + $0x284] ss:$16 sps:$4 sm:$0xff]   ;;  %v2870_v15 = vld [vmem:[#allocation5 + $0x280] ss:$16 sps:$4 sm:$0xff]  }
  0x3c   :  { %1712 = vmatprep.subr.bf16.mxu1 %v2861_v9  ;;  %v2871_v16 = vld [vmem:[#allocation5 + $0x64] ss:$16 sps:$4 sm:$0xff]   ;;  %v2875_v18 = vld [vmem:[#allocation5 + $0x60] ss:$16 sps:$4 sm:$0xff]  }
  0x3d   :  { %v2873_v17 = vld [vmem:[#allocation5 + $0x264] ss:$16 sps:$4 sm:$0xff]   ;;  %v2876_v19 = vld [vmem:[#allocation5 + $0x260] ss:$16 sps:$4 sm:$0xff]  }
  0x3e   :  { %1660 = vmatpush1.bf16.msra.mxu0 %v2863_v10  ;;  %v2877_v20 = vld [vmem:[#allocation5 + $0x44] ss:$16 sps:$4 sm:$0xff]   ;;  %v2881_v22 = vld [vmem:[#allocation5 + $0x40] ss:$16 sps:$4 sm:$0xff]  }
  0x3f   :  { %1713 = vmatpush1.bf16.msra.mxu1 %v2864_v11  ;;  %1661 = vmatprep.subr.bf16.mxu0 %v2865_v12  ;;  %v2879_v21 = vld [vmem:[#allocation5 + $0x244] ss:$16 sps:$4 sm:$0xff]   ;;  %v2882_v23 = vld [vmem:[#allocation5 + $0x240] ss:$16 sps:$4 sm:$0xff]  }
  0x40   :  { %1714 = vmatprep.subr.bf16.mxu1 %v2867_v13  ;;  %v2883_v24 = vld [vmem:[#allocation5 + $0x24] ss:$16 sps:$4 sm:$0xff]   ;;  %v2887_v26 = vld [vmem:[#allocation5 + $0x20] ss:$16 sps:$4 sm:$0xff]  }
  0x41   :  { %v2885_v25 = vld [vmem:[#allocation5 + $0x224] ss:$16 sps:$4 sm:$0xff]   ;;  %v2888_v27 = vld [vmem:[#allocation5 + $0x220] ss:$16 sps:$4 sm:$0xff]  }
  0x42   :  { %1662 = vmatpush1.bf16.msra.mxu0 %v2869_v14  ;;  %v2889_v28 = vld [vmem:[#allocation5 + $0x4] ss:$16 sps:$4 sm:$0xff]   ;;  %v2893_v30 = vld [vmem:[#allocation5] ss:$16 sps:$4 sm:$0xff]   ;;  %v90_v14 = vunpack.c.h.u8.bf16 %v3424_v46  ;;  %v3153_v46 = vld [vmem:[#allocation5 + $0x488] ss:$16 sps:$4 sm:$0xff]  }
  0x43   :  { %1715 = vmatpush1.bf16.msra.mxu1 %v2870_v15  ;;  %1663 = vmatprep.subr.bf16.mxu0 %v2871_v16  ;;  %v2891_v29 = vld [vmem:[#allocation5 + $0x204] ss:$16 sps:$4 sm:$0xff]   ;;  %v2894_v31 = vld [vmem:[#allocation5 + $0x200] ss:$16 sps:$4 sm:$0xff]   ;;  %v92_v15 = vunpack.c.h.u8.bf16 %v3427_v50  ;;  %v3161_v50 = vld [vmem:[#allocation5 + $0x46c] ss:$16 sps:$4 sm:$0xff]  }
  0x44   :  { %1716 = vmatprep.subr.bf16.mxu1 %v2873_v17  ;;  %v2895_v32 = vld [vmem:[#allocation5 + $0x1e4] ss:$16 sps:$4 sm:$0xff]   ;;  %v2899_v34 = vld [vmem:[#allocation5 + $0x1e0] ss:$16 sps:$4 sm:$0xff]  }
  0x45   :  { %v2897_v33 = vld [vmem:[#allocation5 + $0x3e4] ss:$16 sps:$4 sm:$0xff]   ;;  %v2900_v35 = vld [vmem:[#allocation5 + $0x3e0] ss:$16 sps:$4 sm:$0xff]  }
  0x46   :  { %1664 = vmatpush1.bf16.msra.mxu0 %v2875_v18  ;;  %v2901_v36 = vld [vmem:[#allocation5 + $0x1c4] ss:$16 sps:$4 sm:$0xff]   ;;  %v2905_v38 = vld [vmem:[#allocation5 + $0x1c0] ss:$16 sps:$4 sm:$0xff]  }
  0x47   :  { %1717 = vmatpush1.bf16.msra.mxu1 %v2876_v19  ;;  %1665 = vmatprep.subr.bf16.mxu0 %v2877_v20  ;;  %v2903_v37 = vld [vmem:[#allocation5 + $0x3c4] ss:$16 sps:$4 sm:$0xff]   ;;  %v2906_v39 = vld [vmem:[#allocation5 + $0x3c0] ss:$16 sps:$4 sm:$0xff]  }
  0x48   :  { %1718 = vmatprep.subr.bf16.mxu1 %v2879_v21  ;;  %v2907_v40 = vld [vmem:[#allocation5 + $0x1a4] ss:$16 sps:$4 sm:$0xff]   ;;  %v2911_v42 = vld [vmem:[#allocation5 + $0x1a0] ss:$16 sps:$4 sm:$0xff]  }
  0x49   :  { %v2909_v41 = vld [vmem:[#allocation5 + $0x3a4] ss:$16 sps:$4 sm:$0xff]   ;;  %v2912_v43 = vld [vmem:[#allocation5 + $0x3a0] ss:$16 sps:$4 sm:$0xff]  }
  0x4a   :  { %1666 = vmatpush1.bf16.msra.mxu0 %v2881_v22  ;;  %v2913_v44 = vld [vmem:[#allocation5 + $0x184] ss:$16 sps:$4 sm:$0xff]   ;;  %v2917_v47 = vld [vmem:[#allocation5 + $0x180] ss:$16 sps:$4 sm:$0xff]  }
  0x4b   :  { %1719 = vmatpush1.bf16.msra.mxu1 %v2882_v23  ;;  %1667 = vmatprep.subr.bf16.mxu0 %v2883_v24  ;;  %v2915_v45 = vld [vmem:[#allocation5 + $0x384] ss:$16 sps:$4 sm:$0xff]   ;;  %v2918_v48 = vld [vmem:[#allocation5 + $0x380] ss:$16 sps:$4 sm:$0xff]  }
  0x4c   :  { %1720 = vmatprep.subr.bf16.mxu1 %v2885_v25  ;;  %v2919_v51 = vld [vmem:[#allocation5 + $0x164] ss:$16 sps:$4 sm:$0xff]   ;;  %v2923_v54 = vld [vmem:[#allocation5 + $0x160] ss:$16 sps:$4 sm:$0xff]  }
  0x4d   :  { %v2921_v53 = vld [vmem:[#allocation5 + $0x364] ss:$16 sps:$4 sm:$0xff]   ;;  %v2924_v55 = vld [vmem:[#allocation5 + $0x360] ss:$16 sps:$4 sm:$0xff]  }
  0x4e   :  { %1668 = vmatpush1.bf16.msra.mxu0 %v2887_v26  ;;  %v2925_v56 = vld [vmem:[#allocation5 + $0x144] ss:$16 sps:$4 sm:$0xff]   ;;  %v2929_v58 = vld [vmem:[#allocation5 + $0x140] ss:$16 sps:$4 sm:$0xff]  }
  0x4f   :  { %1721 = vmatpush1.bf16.msra.mxu1 %v2888_v27  ;;  %1669 = vmatprep.subr.bf16.mxu0 %v2889_v28  ;;  %v2927_v57 = vld [vmem:[#allocation5 + $0x344] ss:$16 sps:$4 sm:$0xff]   ;;  %v2930_v59 = vld [vmem:[#allocation5 + $0x340] ss:$16 sps:$4 sm:$0xff]  }
  0x50   :  { %1722 = vmatprep.subr.bf16.mxu1 %v2891_v29  ;;  %v2931_v60 = vld [vmem:[#allocation5 + $0x124] ss:$16 sps:$4 sm:$0xff]   ;;  %v2935_v62 = vld [vmem:[#allocation5 + $0x120] ss:$16 sps:$4 sm:$0xff]  }
  0x51   :  { %v2933_v61 = vld [vmem:[#allocation5 + $0x324] ss:$16 sps:$4 sm:$0xff]   ;;  %v2936_v63 = vld [vmem:[#allocation5 + $0x320] ss:$16 sps:$4 sm:$0xff]  }
  0x52   :  { %1670 = vmatpush1.bf16.msra.mxu0 %v2893_v30  ;;  %v2937_v0 = vld [vmem:[#allocation5 + $0x104] ss:$16 sps:$4 sm:$0xff]   ;;  %v2941_v2 = vld [vmem:[#allocation5 + $0x100] ss:$16 sps:$4 sm:$0xff]  }
  0x53   :  { %1723 = vmatpush1.bf16.msra.mxu1 %v2894_v31  ;;  %1671 = vmatprep.subr.bf16.mxu0 %v2895_v32  ;;  %v2939_v1 = vld [vmem:[#allocation5 + $0x304] ss:$16 sps:$4 sm:$0xff]   ;;  %v2942_v3 = vld [vmem:[#allocation5 + $0x300] ss:$16 sps:$4 sm:$0xff]  }
  0x54   :  { %1724 = vmatprep.subr.bf16.mxu1 %v2897_v33  ;;  %v3434_v4 = vld [vmem:[#allocation2] sm:$0xff]  ;;  %v3436_v5 = vld [vmem:[#allocation2 + $0x10] sm:$0xff] }
  0x55   :  { %v2945_v6 = vld [vmem:[#allocation5 + $0x4e4] ss:$16 sps:$4 sm:$0xff]   ;;  %v81_v8 = vunpack.c.l.u8.bf16 %v3434_v4  ;;  %v83_v9 = vunpack.c.l.u8.bf16 %v3436_v5  ;;  %v2943_v10 = vld [vmem:[#allocation5 + $0x4e0] ss:$16 sps:$4 sm:$0xff]   ;;  %v89_v22 = vunpack.c.h.u8.bf16 %v3434_v4  ;;  %v91_v23 = vunpack.c.h.u8.bf16 %v3436_v5  ;;  %v3159_v4 = vld [vmem:[#allocation5 + $0x468] ss:$16 sps:$4 sm:$0xff]  }
  0x56   :  { %1672 = vmatpush2.bf16.msra.mxu0 %v2899_v34  ;;  %v2948_v7 = vld [vmem:[#allocation5 + $0x6e4] ss:$16 sps:$4 sm:$0xff]   ;;  %v2946_v11 = vld [vmem:[#allocation5 + $0x6e0] ss:$16 sps:$4 sm:$0xff]   ;;  %v3167_v5 = vld [vmem:[#allocation5 + $0x44c] ss:$16 sps:$4 sm:$0xff]  }
  0x57   :  { %1725 = vmatpush2.bf16.msra.mxu1 %v2900_v35  ;;  %1673 = vmatprep.subr.bf16.mxu0 %v2901_v36  ;;  %v2951_v12 = vld [vmem:[#allocation5 + $0x4c4] ss:$16 sps:$4 sm:$0xff]   ;;  %v2949_v16 = vld [vmem:[#allocation5 + $0x4c0] ss:$16 sps:$4 sm:$0xff]  }
  0x58   :  { %1726 = vmatprep.subr.bf16.mxu1 %v2903_v37  ;;  %v2954_v13 = vld [vmem:[#allocation5 + $0x6c4] ss:$16 sps:$4 sm:$0xff]   ;;  %v2952_v17 = vld [vmem:[#allocation5 + $0x6c0] ss:$16 sps:$4 sm:$0xff]  }
  0x59   :  { %v2957_v18 = vld [vmem:[#allocation5 + $0x4a4] ss:$16 sps:$4 sm:$0xff]   ;;  %v2955_v20 = vld [vmem:[#allocation5 + $0x4a0] ss:$16 sps:$4 sm:$0xff]  }
  0x5a   :  { %1674 = vmatpush2.bf16.msra.mxu0 %v2905_v38  ;;  %v2960_v19 = vld [vmem:[#allocation5 + $0x6a4] ss:$16 sps:$4 sm:$0xff]   ;;  %v2958_v21 = vld [vmem:[#allocation5 + $0x6a0] ss:$16 sps:$4 sm:$0xff]   ;;  %v3456_v38 = vld [vmem:[#allocation2 + $0x28] sm:$0xff] }
  0x5b   :  { %1727 = vmatpush2.bf16.msra.mxu1 %v2906_v39  ;;  %1675 = vmatprep.subr.bf16.mxu0 %v2907_v40  ;;  %v2963_v24 = vld [vmem:[#allocation5 + $0x484] ss:$16 sps:$4 sm:$0xff]   ;;  %v2961_v26 = vld [vmem:[#allocation5 + $0x480] ss:$16 sps:$4 sm:$0xff]  }
  0x5c   :  { %1728 = vmatprep.subr.bf16.mxu1 %v2909_v41  ;;  %v2966_v25 = vld [vmem:[#allocation5 + $0x684] ss:$16 sps:$4 sm:$0xff]   ;;  %v2964_v27 = vld [vmem:[#allocation5 + $0x680] ss:$16 sps:$4 sm:$0xff]   ;;  %v86_v41 = vunpack.c.l.u8.bf16 %v3456_v38 }
  0x5d   :  { %v2969_v28 = vld [vmem:[#allocation5 + $0x464] ss:$16 sps:$4 sm:$0xff]   ;;  %v2967_v30 = vld [vmem:[#allocation5 + $0x460] ss:$16 sps:$4 sm:$0xff]  }
  0x5e   :  { %1676 = vmatpush2.bf16.msra.mxu0 %v2911_v42  ;;  %v2972_v29 = vld [vmem:[#allocation5 + $0x664] ss:$16 sps:$4 sm:$0xff]   ;;  %v2970_v31 = vld [vmem:[#allocation5 + $0x660] ss:$16 sps:$4 sm:$0xff]   ;;  %v3459_v42 = vld [vmem:[#allocation2 + $0x38] sm:$0xff] }
  0x5f   :  { %1729 = vmatpush2.bf16.msra.mxu1 %v2912_v43  ;;  %1677 = vmatprep.subr.bf16.mxu0 %v2913_v44  ;;  %v2975_v32 = vld [vmem:[#allocation5 + $0x444] ss:$16 sps:$4 sm:$0xff]   ;;  %v2973_v34 = vld [vmem:[#allocation5 + $0x440] ss:$16 sps:$4 sm:$0xff]   ;;  %v88_v44 = vunpack.c.l.u8.bf16 %v3459_v42 }
  0x60   :  { %1730 = vmatprep.subr.bf16.mxu1 %v2915_v45  ;;  %v2978_v33 = vld [vmem:[#allocation5 + $0x644] ss:$16 sps:$4 sm:$0xff]   ;;  %v2976_v35 = vld [vmem:[#allocation5 + $0x640] ss:$16 sps:$4 sm:$0xff]  }
  0x61   :  { %v2981_v36 = vld [vmem:[#allocation5 + $0x424] ss:$16 sps:$4 sm:$0xff]   ;;  %v2979_v39 = vld [vmem:[#allocation5 + $0x420] ss:$16 sps:$4 sm:$0xff]  }
  0x62   :  { %1678 = vmatpush2.bf16.msra.mxu0 %v2917_v47  ;;  %v2984_v37 = vld [vmem:[#allocation5 + $0x624] ss:$16 sps:$4 sm:$0xff]   ;;  %v2982_v40 = vld [vmem:[#allocation5 + $0x620] ss:$16 sps:$4 sm:$0xff]  }
  0x63   :  { %1731 = vmatpush2.bf16.msra.mxu1 %v2918_v48  ;;  %1679 = vmatprep.subr.bf16.mxu0 %v2919_v51  ;;  %v2987_v43 = vld [vmem:[#allocation5 + $0x404] ss:$16 sps:$4 sm:$0xff]   ;;  %v2985_v47 = vld [vmem:[#allocation5 + $0x400] ss:$16 sps:$4 sm:$0xff]  }
  0x64   :  { %1732 = vmatprep.subr.bf16.mxu1 %v2921_v53  ;;  %v2990_v45 = vld [vmem:[#allocation5 + $0x604] ss:$16 sps:$4 sm:$0xff]   ;;  %v2988_v48 = vld [vmem:[#allocation5 + $0x600] ss:$16 sps:$4 sm:$0xff]  }
  0x65   :  { %v2993_v51 = vld [vmem:[#allocation5 + $0x5e4] ss:$16 sps:$4 sm:$0xff]  }
  0x66   :  { %1680 = vmatpush2.bf16.msra.mxu0 %v2923_v54  ;;  %v2996_v53 = vld [vmem:[#allocation5 + $0x7e4] ss:$16 sps:$4 sm:$0xff]   ;;  %v2991_v54 = vld [vmem:[#allocation5 + $0x5e0] ss:$16 sps:$4 sm:$0xff]  }
  0x67   :  { %1733 = vmatpush2.bf16.msra.mxu1 %v2924_v55  ;;  %1681 = vmatprep.subr.bf16.mxu0 %v2925_v56  ;;  %v2994_v55 = vld [vmem:[#allocation5 + $0x7e0] ss:$16 sps:$4 sm:$0xff]   ;;  %v2999_v56 = vld [vmem:[#allocation5 + $0x5c4] ss:$16 sps:$4 sm:$0xff]  }
  0x68   :  { %1734 = vmatprep.subr.bf16.mxu1 %v2927_v57  ;;  %v3002_v57 = vld [vmem:[#allocation5 + $0x7c4] ss:$16 sps:$4 sm:$0xff]  }
  0x6a   :  { %1682 = vmatpush2.bf16.msra.mxu0 %v2929_v58  ;;  %v2997_v58 = vld [vmem:[#allocation5 + $0x5c0] ss:$16 sps:$4 sm:$0xff]  }
  0x6b   :  { %1735 = vmatpush2.bf16.msra.mxu1 %v2930_v59  ;;  %1683 = vmatprep.subr.bf16.mxu0 %v2931_v60  ;;  %v3000_v59 = vld [vmem:[#allocation5 + $0x7c0] ss:$16 sps:$4 sm:$0xff]   ;;  %v3005_v60 = vld [vmem:[#allocation5 + $0x5a4] ss:$16 sps:$4 sm:$0xff]  }
  0x6c   :  { %1736 = vmatprep.subr.bf16.mxu1 %v2933_v61  ;;  %v3008_v61 = vld [vmem:[#allocation5 + $0x7a4] ss:$16 sps:$4 sm:$0xff]  }
  0x6e   :  { %1684 = vmatpush2.bf16.msra.mxu0 %v2935_v62  ;;  %v3003_v62 = vld [vmem:[#allocation5 + $0x5a0] ss:$16 sps:$4 sm:$0xff]  }
  0x6f   :  { %1737 = vmatpush2.bf16.msra.mxu1 %v2936_v63  ;;  %1685 = vmatprep.subr.bf16.mxu0 %v2937_v0  ;;  %v3006_v63 = vld [vmem:[#allocation5 + $0x7a0] ss:$16 sps:$4 sm:$0xff]   ;;  %v3011_v0 = vld [vmem:[#allocation5 + $0x584] ss:$16 sps:$4 sm:$0xff]  }
  0x70   :  { %1738 = vmatprep.subr.bf16.mxu1 %v2939_v1  ;;  %v3014_v1 = vld [vmem:[#allocation5 + $0x784] ss:$16 sps:$4 sm:$0xff]  }
  0x72   :  { %1686 = vmatpush2.bf16.msra.mxu0 %v2941_v2  ;;  %v3009_v2 = vld [vmem:[#allocation5 + $0x580] ss:$16 sps:$4 sm:$0xff]  }
  0x73   :  { %1739 = vmatpush2.bf16.msra.mxu1 %v2942_v3  ;;  %1761 = vmatprep.subr.bf16.mxu0 %v2945_v6  ;;  %v3012_v3 = vld [vmem:[#allocation5 + $0x780] ss:$16 sps:$4 sm:$0xff]   ;;  %v3017_v6 = vld [vmem:[#allocation5 + $0x564] ss:$16 sps:$4 sm:$0xff]  }
  0x74   :  { %1814 = vmatprep.subr.bf16.mxu1 %v2948_v7  ;;  %v3020_v7 = vld [vmem:[#allocation5 + $0x764] ss:$16 sps:$4 sm:$0xff]  }
  0x75   :  { %1688 = vmatmul.mubr.bf16.vlgmr.msra.gmra.mxu0 %v81_v8 }
  0x76   :  { %1741 = vmatmul.mubr.bf16.vlgmr.msra.gmra.mxu1 %v83_v9  ;;  %1762 = vmatpush1.bf16.msra.mxu0 %v2943_v10  ;;  %v3015_v10 = vld [vmem:[#allocation5 + $0x560] ss:$16 sps:$4 sm:$0xff]  }
  0x77   :  { %1815 = vmatpush1.bf16.msra.mxu1 %v2946_v11  ;;  %1763 = vmatprep.subr.bf16.mxu0 %v2951_v12  ;;  %v3018_v11 = vld [vmem:[#allocation5 + $0x760] ss:$16 sps:$4 sm:$0xff]   ;;  %v3023_v12 = vld [vmem:[#allocation5 + $0x544] ss:$16 sps:$4 sm:$0xff]  }
  0x78   :  { %1816 = vmatprep.subr.bf16.mxu1 %v2954_v13  ;;  %1697 = vmatprep.mubr.bf16.mxu0 %v90_v14  ;;  %v3026_v13 = vld [vmem:[#allocation5 + $0x744] ss:$16 sps:$4 sm:$0xff]  }
  0x79   :  { %1750 = vmatprep.mubr.bf16.mxu1 %v92_v15 }
  0x7a   :  { %1764 = vmatpush1.bf16.msra.mxu0 %v2949_v16  ;;  %v3021_v16 = vld [vmem:[#allocation5 + $0x540] ss:$16 sps:$4 sm:$0xff]  }
  0x7b   :  { %1817 = vmatpush1.bf16.msra.mxu1 %v2952_v17  ;;  %1765 = vmatprep.subr.bf16.mxu0 %v2957_v18  ;;  %v3024_v17 = vld [vmem:[#allocation5 + $0x740] ss:$16 sps:$4 sm:$0xff]   ;;  %v3029_v18 = vld [vmem:[#allocation5 + $0x524] ss:$16 sps:$4 sm:$0xff]  }
  0x7c   :  { %1818 = vmatprep.subr.bf16.mxu1 %v2960_v19  ;;  %v3032_v19 = vld [vmem:[#allocation5 + $0x724] ss:$16 sps:$4 sm:$0xff]  }
  0x7d   :  { %1698 = vmatmul.mubr.bf16.gmra.mxu0 %v89_v22 }
  0x7e   :  { %1751 = vmatmul.mubr.bf16.gmra.mxu1 %v91_v23  ;;  %1766 = vmatpush1.bf16.msra.mxu0 %v2955_v20  ;;  %v3027_v20 = vld [vmem:[#allocation5 + $0x520] ss:$16 sps:$4 sm:$0xff]  }
  0x7f   :  { %1819 = vmatpush1.bf16.msra.mxu1 %v2958_v21  ;;  %1767 = vmatprep.subr.bf16.mxu0 %v2963_v24  ;;  %v3030_v21 = vld [vmem:[#allocation5 + $0x720] ss:$16 sps:$4 sm:$0xff]   ;;  %v3035_v24 = vld [vmem:[#allocation5 + $0x504] ss:$16 sps:$4 sm:$0xff]  }
  0x80   :  { %1820 = vmatprep.subr.bf16.mxu1 %v2966_v25  ;;  %1793 = vmatprep.mubr.bf16.mxu0 %v86_v41  ;;  %v3038_v25 = vld [vmem:[#allocation5 + $0x704] ss:$16 sps:$4 sm:$0xff]  }
  0x81   :  { %1846 = vmatprep.mubr.bf16.mxu1 %v88_v44 }
  0x82   :  { %1768 = vmatpush1.bf16.msra.mxu0 %v2961_v26  ;;  %v3033_v26 = vld [vmem:[#allocation5 + $0x500] ss:$16 sps:$4 sm:$0xff]  }
  0x83   :  { %1821 = vmatpush1.bf16.msra.mxu1 %v2964_v27  ;;  %1769 = vmatprep.subr.bf16.mxu0 %v2969_v28  ;;  %v3036_v27 = vld [vmem:[#allocation5 + $0x700] ss:$16 sps:$4 sm:$0xff]  }
  0x84   :  { %1822 = vmatprep.subr.bf16.mxu1 %v2972_v29  ;;  %v3466_v28 = vld [vmem:[#allocation2 + $0x20] sm:$0xff]  ;;  %v3468_v29 = vld [vmem:[#allocation2 + $0x30] sm:$0xff] }
  0x86   :  { %1770 = vmatpush1.bf16.msra.mxu0 %v2967_v30  ;;  %v3041_v30 = vld [vmem:[#allocation5 + $0xec] ss:$16 sps:$4 sm:$0xff]  }
  0x87   :  { %1823 = vmatpush1.bf16.msra.mxu1 %v2970_v31  ;;  %1771 = vmatprep.subr.bf16.mxu0 %v2975_v32  ;;  %v3044_v31 = vld [vmem:[#allocation5 + $0x2ec] ss:$16 sps:$4 sm:$0xff]   ;;  %v85_v32 = vunpack.c.l.u8.bf16 %v3466_v28 }
  0x88   :  { %1824 = vmatprep.subr.bf16.mxu1 %v2978_v33  ;;  %v87_v33 = vunpack.c.l.u8.bf16 %v3468_v29 }
  0x8a   :  { %1772 = vmatpush1.bf16.msra.mxu0 %v2973_v34  ;;  %v3039_v34 = vld [vmem:[#allocation5 + $0xe8] ss:$16 sps:$4 sm:$0xff]  }
  0x8b   :  { %1825 = vmatpush1.bf16.msra.mxu1 %v2976_v35  ;;  %1773 = vmatprep.subr.bf16.mxu0 %v2981_v36  ;;  %v3042_v35 = vld [vmem:[#allocation5 + $0x2e8] ss:$16 sps:$4 sm:$0xff]   ;;  %v3047_v36 = vld [vmem:[#allocation5 + $0xcc] ss:$16 sps:$4 sm:$0xff]  }
  0x8c   :  { %1826 = vmatprep.subr.bf16.mxu1 %v2984_v37  ;;  %v3050_v37 = vld [vmem:[#allocation5 + $0x2cc] ss:$16 sps:$4 sm:$0xff]  }
  0x8e   :  { %1774 = vmatpush1.bf16.msra.mxu0 %v2979_v39  ;;  %v94_v39 = vunpack.c.h.u8.bf16 %v3456_v38  ;;  %v3248_v38 = vld [vmem:[#allocation8 + $0xb8] sm:$0xff]  }
  0x8f   :  { %1827 = vmatpush1.bf16.msra.mxu1 %v2982_v40  ;;  %1775 = vmatprep.subr.bf16.mxu0 %v2987_v43  ;;  %v96_v40 = vunpack.c.h.u8.bf16 %v3459_v42  ;;  %v3045_v43 = vld [vmem:[#allocation5 + $0xc8] ss:$16 sps:$4 sm:$0xff]   ;;  %v3239_v42 = vld [vmem:[#allocation8 + $0x58] sm:$0xff]  }
  0x90   :  { %1828 = vmatprep.subr.bf16.mxu1 %v2990_v45  ;;  %v3048_v45 = vld [vmem:[#allocation5 + $0x2c8] ss:$16 sps:$4 sm:$0xff]  }
  0x92   :  { %1776 = vmatpush1.bf16.msra.mxu0 %v2985_v47  ;;  %v3053_v47 = vld [vmem:[#allocation5 + $0xac] ss:$16 sps:$4 sm:$0xff]  }
  0x93   :  { %1829 = vmatpush1.bf16.msra.mxu1 %v2988_v48  ;;  %1777 = vmatprep.subr.bf16.mxu0 %v2993_v51  ;;  %v3056_v48 = vld [vmem:[#allocation5 + $0x2ac] ss:$16 sps:$4 sm:$0xff]   ;;  %v93_v51 = vunpack.c.h.u8.bf16 %v3466_v28 }
  0x94   :  { %1830 = vmatprep.subr.bf16.mxu1 %v2996_v53  ;;  %v3051_v53 = vld [vmem:[#allocation5 + $0xa8] ss:$16 sps:$4 sm:$0xff]   ;;  %v3251_v28 = vld [vmem:[#allocation8 + $0xe8] sm:$0xff]  }
  0x96   :  { %1778 = vmatpush2.bf16.msra.mxu0 %v2991_v54  ;;  %v3054_v54 = vld [vmem:[#allocation5 + $0x2a8] ss:$16 sps:$4 sm:$0xff]  }
  0x97   :  { %1831 = vmatpush2.bf16.msra.mxu1 %v2994_v55  ;;  %1779 = vmatprep.subr.bf16.mxu0 %v2999_v56  ;;  %v95_v55 = vunpack.c.h.u8.bf16 %v3468_v29  ;;  %v3059_v56 = vld [vmem:[#allocation5 + $0x8c] ss:$16 sps:$4 sm:$0xff]   ;;  %v3253_v29 = vld [vmem:[#allocation8 + $0xe0] sm:$0xff]  }
  0x98   :  { %1832 = vmatprep.subr.bf16.mxu1 %v3002_v57  ;;  %v3062_v57 = vld [vmem:[#allocation5 + $0x28c] ss:$16 sps:$4 sm:$0xff]  }
  0x9a   :  { %1780 = vmatpush2.bf16.msra.mxu0 %v2997_v58  ;;  %v3057_v58 = vld [vmem:[#allocation5 + $0x88] ss:$16 sps:$4 sm:$0xff]  }
  0x9b   :  { %1833 = vmatpush2.bf16.msra.mxu1 %v3000_v59  ;;  %1781 = vmatprep.subr.bf16.mxu0 %v3005_v60  ;;  %v3060_v59 = vld [vmem:[#allocation5 + $0x288] ss:$16 sps:$4 sm:$0xff]   ;;  %v3065_v60 = vld [vmem:[#allocation5 + $0x6c] ss:$16 sps:$4 sm:$0xff]  }
  0x9c   :  { %1834 = vmatprep.subr.bf16.mxu1 %v3008_v61  ;;  %v3068_v61 = vld [vmem:[#allocation5 + $0x26c] ss:$16 sps:$4 sm:$0xff]  }
  0x9e   :  { %1782 = vmatpush2.bf16.msra.mxu0 %v3003_v62  ;;  %v3063_v62 = vld [vmem:[#allocation5 + $0x68] ss:$16 sps:$4 sm:$0xff]  }
  0x9f   :  { %1835 = vmatpush2.bf16.msra.mxu1 %v3006_v63  ;;  %1783 = vmatprep.subr.bf16.mxu0 %v3011_v0  ;;  %v3066_v63 = vld [vmem:[#allocation5 + $0x268] ss:$16 sps:$4 sm:$0xff]   ;;  %v3071_v0 = vld [vmem:[#allocation5 + $0x4c] ss:$16 sps:$4 sm:$0xff]  }
  0xa0   :  { %1836 = vmatprep.subr.bf16.mxu1 %v3014_v1  ;;  %v3074_v1 = vld [vmem:[#allocation5 + $0x24c] ss:$16 sps:$4 sm:$0xff]  }
  0xa2   :  { %1784 = vmatpush2.bf16.msra.mxu0 %v3009_v2  ;;  %v3069_v2 = vld [vmem:[#allocation5 + $0x48] ss:$16 sps:$4 sm:$0xff]  }
  0xa3   :  { %1837 = vmatpush2.bf16.msra.mxu1 %v3012_v3  ;;  %1785 = vmatprep.subr.bf16.mxu0 %v3017_v6  ;;  %v3072_v3 = vld [vmem:[#allocation5 + $0x248] ss:$16 sps:$4 sm:$0xff]   ;;  %v3077_v6 = vld [vmem:[#allocation5 + $0x2c] ss:$16 sps:$4 sm:$0xff]  }
  0xa4   :  { %1838 = vmatprep.subr.bf16.mxu1 %v3020_v7  ;;  %v3080_v7 = vld [vmem:[#allocation5 + $0x22c] ss:$16 sps:$4 sm:$0xff]  }
  0xa6   :  { %1786 = vmatpush2.bf16.msra.mxu0 %v3015_v10  ;;  %v3078_v10 = vld [vmem:[#allocation5 + $0x228] ss:$16 sps:$4 sm:$0xff]  }
  0xa7   :  { %1839 = vmatpush2.bf16.msra.mxu1 %v3018_v11  ;;  %1787 = vmatprep.subr.bf16.mxu0 %v3023_v12  ;;  %v3086_v11 = vld [vmem:[#allocation5 + $0x20c] ss:$16 sps:$4 sm:$0xff]   ;;  %v3081_v12 = vld [vmem:[#allocation5 + $0x8] ss:$16 sps:$4 sm:$0xff]  }
  0xa8   :  { %1840 = vmatprep.subr.bf16.mxu1 %v3026_v13  ;;  %v3084_v13 = vld [vmem:[#allocation5 + $0x208] ss:$16 sps:$4 sm:$0xff]  }
  0xaa   :  { %1788 = vmatpush2.bf16.msra.mxu0 %v3021_v16  ;;  %v3089_v16 = vld [vmem:[#allocation5 + $0x1ec] ss:$16 sps:$4 sm:$0xff]  }
  0xab   :  { %1841 = vmatpush2.bf16.msra.mxu1 %v3024_v17  ;;  %1789 = vmatprep.subr.bf16.mxu0 %v3029_v18  ;;  %v3092_v17 = vld [vmem:[#allocation5 + $0x3ec] ss:$16 sps:$4 sm:$0xff]   ;;  %v3087_v18 = vld [vmem:[#allocation5 + $0x1e8] ss:$16 sps:$4 sm:$0xff]  }
  0xac   :  { %1842 = vmatprep.subr.bf16.mxu1 %v3032_v19  ;;  %v3090_v19 = vld [vmem:[#allocation5 + $0x3e8] ss:$16 sps:$4 sm:$0xff]  }
  0xae   :  { %1790 = vmatpush2.bf16.msra.mxu0 %v3027_v20  ;;  %v3095_v20 = vld [vmem:[#allocation5 + $0x1cc] ss:$16 sps:$4 sm:$0xff]  }
  0xaf   :  { %1843 = vmatpush2.bf16.msra.mxu1 %v3030_v21  ;;  %1791 = vmatprep.subr.bf16.mxu0 %v3035_v24  ;;  %v3098_v21 = vld [vmem:[#allocation5 + $0x3cc] ss:$16 sps:$4 sm:$0xff]   ;;  %v3093_v24 = vld [vmem:[#allocation5 + $0x1c8] ss:$16 sps:$4 sm:$0xff]  }
  0xb0   :  { %1844 = vmatprep.subr.bf16.mxu1 %v3038_v25  ;;  %v3096_v25 = vld [vmem:[#allocation5 + $0x3c8] ss:$16 sps:$4 sm:$0xff]  }
  0xb2   :  { %1792 = vmatpush2.bf16.msra.mxu0 %v3033_v26  ;;  %v3101_v26 = vld [vmem:[#allocation5 + $0x1ac] ss:$16 sps:$4 sm:$0xff]  }
  0xb3   :  { %1845 = vmatpush2.bf16.msra.mxu1 %v3036_v27  ;;  %1867 = vmatprep.subr.bf16.mxu0 %v3041_v30  ;;  %v3104_v27 = vld [vmem:[#allocation5 + $0x3ac] ss:$16 sps:$4 sm:$0xff]   ;;  %v3099_v30 = vld [vmem:[#allocation5 + $0x1a8] ss:$16 sps:$4 sm:$0xff]  }
  0xb4   :  { %1920 = vmatprep.subr.bf16.mxu1 %v3044_v31  ;;  %v3102_v31 = vld [vmem:[#allocation5 + $0x3a8] ss:$16 sps:$4 sm:$0xff]  }
  0xb5   :  { %1794 = vmatmul.mubr.bf16.vlgmr.msra.gmra.mxu0 %v85_v32 }
  0xb6   :  { %1847 = vmatmul.mubr.bf16.vlgmr.msra.gmra.mxu1 %v87_v33  ;;  %1868 = vmatpush1.bf16.msra.mxu0 %v3039_v34  ;;  %v3107_v34 = vld [vmem:[#allocation5 + $0x18c] ss:$16 sps:$4 sm:$0xff]  }
  0xb7   :  { %1921 = vmatpush1.bf16.msra.mxu1 %v3042_v35  ;;  %1869 = vmatprep.subr.bf16.mxu0 %v3047_v36  ;;  %v3110_v35 = vld [vmem:[#allocation5 + $0x38c] ss:$16 sps:$4 sm:$0xff]   ;;  %v3105_v36 = vld [vmem:[#allocation5 + $0x188] ss:$16 sps:$4 sm:$0xff]  }
  0xb8   :  { %1922 = vmatprep.subr.bf16.mxu1 %v3050_v37  ;;  %1803 = vmatprep.mubr.bf16.mxu0 %v94_v39  ;;  %v3108_v37 = vld [vmem:[#allocation5 + $0x388] ss:$16 sps:$4 sm:$0xff]  }
  0xb9   :  { %1856 = vmatprep.mubr.bf16.mxu1 %v96_v40 }
  0xba   :  { %1870 = vmatpush1.bf16.msra.mxu0 %v3045_v43  ;;  %v3113_v43 = vld [vmem:[#allocation5 + $0x16c] ss:$16 sps:$4 sm:$0xff]  }
  0xbb   :  { %1923 = vmatpush1.bf16.msra.mxu1 %v3048_v45  ;;  %1871 = vmatprep.subr.bf16.mxu0 %v3053_v47  ;;  %v3116_v45 = vld [vmem:[#allocation5 + $0x36c] ss:$16 sps:$4 sm:$0xff]   ;;  %v3111_v47 = vld [vmem:[#allocation5 + $0x168] ss:$16 sps:$4 sm:$0xff]  }
  0xbc   :  { %1924 = vmatprep.subr.bf16.mxu1 %v3056_v48  ;;  %v3114_v48 = vld [vmem:[#allocation5 + $0x368] ss:$16 sps:$4 sm:$0xff]  }
  0xbd   :  { %1804 = vmatmul.mubr.bf16.gmra.mxu0 %v93_v51 }
  0xbe   :  { %1857 = vmatmul.mubr.bf16.gmra.mxu1 %v95_v55  ;;  %1872 = vmatpush1.bf16.msra.mxu0 %v3051_v53  ;;  %v3119_v53 = vld [vmem:[#allocation5 + $0x14c] ss:$16 sps:$4 sm:$0xff]  }
  0xbf   :  { %1925 = vmatpush1.bf16.msra.mxu1 %v3054_v54  ;;  %1873 = vmatprep.subr.bf16.mxu0 %v3059_v56  ;;  %v3122_v54 = vld [vmem:[#allocation5 + $0x34c] ss:$16 sps:$4 sm:$0xff]   ;;  %v3117_v56 = vld [vmem:[#allocation5 + $0x148] ss:$16 sps:$4 sm:$0xff]  }
  0xc0   :  { %1926 = vmatprep.subr.bf16.mxu1 %v3062_v57  ;;  %1899 = vmatprep.mubr.bf16.mxu0 %v82_v49  ;;  %v3075_v49 = vld [vmem:[#allocation5 + $0x28] ss:$16 sps:$4 sm:$0xff]  }
  0xc1   :  { %1952 = vmatprep.mubr.bf16.mxu1 %v84_v52  ;;  %v3083_v52 = vld [vmem:[#allocation5 + $0xc] ss:$16 sps:$4 sm:$0xff]   ;;  %v3120_v57 = vld [vmem:[#allocation5 + $0x348] ss:$16 sps:$4 sm:$0xff]  }
  0xc2   :  { %1874 = vmatpush1.bf16.msra.mxu0 %v3057_v58  ;;  %v3125_v58 = vld [vmem:[#allocation5 + $0x12c] ss:$16 sps:$4 sm:$0xff]  }
  0xc3   :  { %1927 = vmatpush1.bf16.msra.mxu1 %v3060_v59  ;;  %1875 = vmatprep.subr.bf16.mxu0 %v3065_v60  ;;  %v3128_v59 = vld [vmem:[#allocation5 + $0x32c] ss:$16 sps:$4 sm:$0xff]   ;;  %v3123_v60 = vld [vmem:[#allocation5 + $0x128] ss:$16 sps:$4 sm:$0xff]  }
  0xc4   :  { %1928 = vmatprep.subr.bf16.mxu1 %v3068_v61  ;;  %v3126_v61 = vld [vmem:[#allocation5 + $0x328] ss:$16 sps:$4 sm:$0xff]  }
  0xc6   :  { %1876 = vmatpush1.bf16.msra.mxu0 %v3063_v62  ;;  %v3131_v62 = vld [vmem:[#allocation5 + $0x10c] ss:$16 sps:$4 sm:$0xff]  }
  0xc7   :  { %1929 = vmatpush1.bf16.msra.mxu1 %v3066_v63  ;;  %1877 = vmatprep.subr.bf16.mxu0 %v3071_v0  ;;  %v3134_v63 = vld [vmem:[#allocation5 + $0x30c] ss:$16 sps:$4 sm:$0xff]   ;;  %v3129_v0 = vld [vmem:[#allocation5 + $0x108] ss:$16 sps:$4 sm:$0xff]  }
  0xc8   :  { %1930 = vmatprep.subr.bf16.mxu1 %v3074_v1  ;;  %v3132_v1 = vld [vmem:[#allocation5 + $0x308] ss:$16 sps:$4 sm:$0xff]  }
  0xca   :  { %1878 = vmatpush1.bf16.msra.mxu0 %v3069_v2  ;;  %v3137_v2 = vld [vmem:[#allocation5 + $0x4ec] ss:$16 sps:$4 sm:$0xff]  }
  0xcb   :  { %1931 = vmatpush1.bf16.msra.mxu1 %v3072_v3  ;;  %1879 = vmatprep.subr.bf16.mxu0 %v3077_v6  ;;  %v3140_v3 = vld [vmem:[#allocation5 + $0x6ec] ss:$16 sps:$4 sm:$0xff]   ;;  %v3135_v6 = vld [vmem:[#allocation5 + $0x4e8] ss:$16 sps:$4 sm:$0xff]  }
  0xcc   :  { %1932 = vmatprep.subr.bf16.mxu1 %v3080_v7  ;;  %v3138_v7 = vld [vmem:[#allocation5 + $0x6e8] ss:$16 sps:$4 sm:$0xff]  }
  0xce   :  { %1880 = vmatpush1.bf16.msra.mxu0 %v3075_v49  ;;  %v3143_v49 = vld [vmem:[#allocation5 + $0x4cc] ss:$16 sps:$4 sm:$0xff]  }
  0xcf   :  { %1933 = vmatpush1.bf16.msra.mxu1 %v3078_v10  ;;  %1881 = vmatprep.subr.bf16.mxu0 %v3083_v52  ;;  %v3146_v10 = vld [vmem:[#allocation5 + $0x6cc] ss:$16 sps:$4 sm:$0xff]   ;;  %v3141_v52 = vld [vmem:[#allocation5 + $0x4c8] ss:$16 sps:$4 sm:$0xff]  }
  0xd0   :  { %1934 = vmatprep.subr.bf16.mxu1 %v3086_v11  ;;  %v3144_v11 = vld [vmem:[#allocation5 + $0x6c8] ss:$16 sps:$4 sm:$0xff]  }
  0xd2   :  { %1882 = vmatpush1.bf16.msra.mxu0 %v3081_v12  ;;  %v3149_v12 = vld [vmem:[#allocation5 + $0x4ac] ss:$16 sps:$4 sm:$0xff]  }
  0xd3   :  { %1935 = vmatpush1.bf16.msra.mxu1 %v3084_v13  ;;  %1883 = vmatprep.subr.bf16.mxu0 %v3089_v16  ;;  %v3152_v13 = vld [vmem:[#allocation5 + $0x6ac] ss:$16 sps:$4 sm:$0xff]   ;;  %v3147_v16 = vld [vmem:[#allocation5 + $0x4a8] ss:$16 sps:$4 sm:$0xff]  }
  0xd4   :  { %1936 = vmatprep.subr.bf16.mxu1 %v3092_v17  ;;  %v3150_v17 = vld [vmem:[#allocation5 + $0x6a8] ss:$16 sps:$4 sm:$0xff]  }
  0xd6   :  { %1884 = vmatpush2.bf16.msra.mxu0 %v3087_v18  ;;  %v3165_v18 = vld [vmem:[#allocation5 + $0x448] ss:$16 sps:$4 sm:$0xff]  }
  0xd7   :  { %1937 = vmatpush2.bf16.msra.mxu1 %v3090_v19  ;;  %1885 = vmatprep.subr.bf16.mxu0 %v3095_v20  ;;  %v3168_v19 = vld [vmem:[#allocation5 + $0x648] ss:$16 sps:$4 sm:$0xff]   ;;  %v3173_v20 = vld [vmem:[#allocation5 + $0x42c] ss:$16 sps:$4 sm:$0xff]  }
  0xd8   :  { %1938 = vmatprep.subr.bf16.mxu1 %v3098_v21  ;;  %v3176_v21 = vld [vmem:[#allocation5 + $0x62c] ss:$16 sps:$4 sm:$0xff]  }
  0xda   :  { %1886 = vmatpush2.bf16.msra.mxu0 %v3093_v24  ;;  %v3179_v24 = vld [vmem:[#allocation5 + $0x40c] ss:$16 sps:$4 sm:$0xff]  }
  0xdb   :  { %1939 = vmatpush2.bf16.msra.mxu1 %v3096_v25  ;;  %1887 = vmatprep.subr.bf16.mxu0 %v3101_v26  ;;  %v3182_v25 = vld [vmem:[#allocation5 + $0x60c] ss:$16 sps:$4 sm:$0xff]   ;;  %v3177_v26 = vld [vmem:[#allocation5 + $0x408] ss:$16 sps:$4 sm:$0xff]  }
  0xdc   :  { %1940 = vmatprep.subr.bf16.mxu1 %v3104_v27  ;;  %v3180_v27 = vld [vmem:[#allocation5 + $0x608] ss:$16 sps:$4 sm:$0xff]  }
  0xde   :  { %1888 = vmatpush2.bf16.msra.mxu0 %v3099_v30  ;;  %v3185_v30 = vld [vmem:[#allocation5 + $0x5ec] ss:$16 sps:$4 sm:$0xff]  }
  0xdf   :  { %1941 = vmatpush2.bf16.msra.mxu1 %v3102_v31  ;;  %1889 = vmatprep.subr.bf16.mxu0 %v3107_v34  ;;  %v3188_v31 = vld [vmem:[#allocation5 + $0x7ec] ss:$16 sps:$4 sm:$0xff]   ;;  %v3183_v34 = vld [vmem:[#allocation5 + $0x5e8] ss:$16 sps:$4 sm:$0xff]  }
  0xe0   :  { %1942 = vmatprep.subr.bf16.mxu1 %v3110_v35  ;;  %v3186_v35 = vld [vmem:[#allocation5 + $0x7e8] ss:$16 sps:$4 sm:$0xff]  }
  0xe2   :  { %1890 = vmatpush2.bf16.msra.mxu0 %v3105_v36  ;;  %v3191_v36 = vld [vmem:[#allocation5 + $0x5cc] ss:$16 sps:$4 sm:$0xff]  }
  0xe3   :  { %1943 = vmatpush2.bf16.msra.mxu1 %v3108_v37  ;;  %1891 = vmatprep.subr.bf16.mxu0 %v3113_v43  ;;  %v3194_v37 = vld [vmem:[#allocation5 + $0x7cc] ss:$16 sps:$4 sm:$0xff]   ;;  %v3189_v43 = vld [vmem:[#allocation5 + $0x5c8] ss:$16 sps:$4 sm:$0xff]  }
  0xe4   :  { %1944 = vmatprep.subr.bf16.mxu1 %v3116_v45  ;;  %v3192_v45 = vld [vmem:[#allocation5 + $0x7c8] ss:$16 sps:$4 sm:$0xff]  }
  0xe6   :  { %1892 = vmatpush2.bf16.msra.mxu0 %v3111_v47  ;;  %v3197_v47 = vld [vmem:[#allocation5 + $0x5ac] ss:$16 sps:$4 sm:$0xff]  }
  0xe7   :  { %1945 = vmatpush2.bf16.msra.mxu1 %v3114_v48  ;;  %1893 = vmatprep.subr.bf16.mxu0 %v3119_v53  ;;  %v3200_v48 = vld [vmem:[#allocation5 + $0x7ac] ss:$16 sps:$4 sm:$0xff]   ;;  %v3195_v53 = vld [vmem:[#allocation5 + $0x5a8] ss:$16 sps:$4 sm:$0xff]  }
  0xe8   :  { %1946 = vmatprep.subr.bf16.mxu1 %v3122_v54  ;;  %v3198_v54 = vld [vmem:[#allocation5 + $0x7a8] ss:$16 sps:$4 sm:$0xff]  }
  0xea   :  { %1894 = vmatpush2.bf16.msra.mxu0 %v3117_v56  ;;  %v3203_v56 = vld [vmem:[#allocation5 + $0x58c] ss:$16 sps:$4 sm:$0xff]  }
  0xeb   :  { %1947 = vmatpush2.bf16.msra.mxu1 %v3120_v57  ;;  %1895 = vmatprep.subr.bf16.mxu0 %v3125_v58  ;;  %v3206_v57 = vld [vmem:[#allocation5 + $0x78c] ss:$16 sps:$4 sm:$0xff]   ;;  %v3201_v58 = vld [vmem:[#allocation5 + $0x588] ss:$16 sps:$4 sm:$0xff]  }
  0xec   :  { %1948 = vmatprep.subr.bf16.mxu1 %v3128_v59  ;;  %v3204_v59 = vld [vmem:[#allocation5 + $0x788] ss:$16 sps:$4 sm:$0xff]  }
  0xee   :  { %1896 = vmatpush2.bf16.msra.mxu0 %v3123_v60  ;;  %v3209_v60 = vld [vmem:[#allocation5 + $0x56c] ss:$16 sps:$4 sm:$0xff]  }
  0xef   :  { %1949 = vmatpush2.bf16.msra.mxu1 %v3126_v61  ;;  %1897 = vmatprep.subr.bf16.mxu0 %v3131_v62  ;;  %v3212_v61 = vld [vmem:[#allocation5 + $0x76c] ss:$16 sps:$4 sm:$0xff]   ;;  %v3207_v62 = vld [vmem:[#allocation5 + $0x568] ss:$16 sps:$4 sm:$0xff]  }
  0xf0   :  { %1950 = vmatprep.subr.bf16.mxu1 %v3134_v63  ;;  %v3210_v63 = vld [vmem:[#allocation5 + $0x768] ss:$16 sps:$4 sm:$0xff]  }
  0xf2   :  { %1898 = vmatpush2.bf16.msra.mxu0 %v3129_v0  ;;  %v3215_v0 = vld [vmem:[#allocation5 + $0x54c] ss:$16 sps:$4 sm:$0xff]  }
  0xf3   :  { %1951 = vmatpush2.bf16.msra.mxu1 %v3132_v1  ;;  %1973 = vmatprep.subr.bf16.mxu0 %v3137_v2  ;;  %v3218_v1 = vld [vmem:[#allocation5 + $0x74c] ss:$16 sps:$4 sm:$0xff]   ;;  %v3213_v2 = vld [vmem:[#allocation5 + $0x548] ss:$16 sps:$4 sm:$0xff]  }
  0xf4   :  { %2026 = vmatprep.subr.bf16.mxu1 %v3140_v3  ;;  %v3216_v3 = vld [vmem:[#allocation5 + $0x748] ss:$16 sps:$4 sm:$0xff]  }
  0xf5   :  { %1900 = vmatmul.mubr.bf16.vlgmr.msra.gmra.mxu0 %v81_v8  ;;  %v3155_v8 = vld [vmem:[#allocation5 + $0x48c] ss:$16 sps:$4 sm:$0xff]  }
  0xf6   :  { %1953 = vmatmul.mubr.bf16.vlgmr.msra.gmra.mxu1 %v83_v9  ;;  %1974 = vmatpush1.bf16.msra.mxu0 %v3135_v6  ;;  %v3158_v9 = vld [vmem:[#allocation5 + $0x68c] ss:$16 sps:$4 sm:$0xff]  }
  0xf7   :  { %2027 = vmatpush1.bf16.msra.mxu1 %v3138_v7  ;;  %1975 = vmatprep.subr.bf16.mxu0 %v3143_v49  ;;  %v3221_v6 = vld [vmem:[#allocation5 + $0x52c] ss:$16 sps:$4 sm:$0xff]   ;;  %v3219_v49 = vld [vmem:[#allocation5 + $0x528] ss:$16 sps:$4 sm:$0xff]  }
  0xf8   :  { %2028 = vmatprep.subr.bf16.mxu1 %v3146_v10  ;;  %1909 = vmatprep.mubr.bf16.mxu0 %v90_v14  ;;  %v3156_v14 = vld [vmem:[#allocation5 + $0x688] ss:$16 sps:$4 sm:$0xff]   ;;  %v3224_v7 = vld [vmem:[#allocation5 + $0x72c] ss:$16 sps:$4 sm:$0xff]  }
  0xf9   :  { %1962 = vmatprep.mubr.bf16.mxu1 %v92_v15  ;;  %v3164_v15 = vld [vmem:[#allocation5 + $0x66c] ss:$16 sps:$4 sm:$0xff]   ;;  %v3222_v10 = vld [vmem:[#allocation5 + $0x728] ss:$16 sps:$4 sm:$0xff]  }
  0xfa   :  { %1976 = vmatpush1.bf16.msra.mxu0 %v3141_v52  ;;  %v3227_v52 = vld [vmem:[#allocation5 + $0x50c] ss:$16 sps:$4 sm:$0xff]  }
  0xfb   :  { %2029 = vmatpush1.bf16.msra.mxu1 %v3144_v11  ;;  %1977 = vmatprep.subr.bf16.mxu0 %v3149_v12  ;;  %v3230_v11 = vld [vmem:[#allocation5 + $0x70c] ss:$16 sps:$4 sm:$0xff]   ;;  %v3225_v12 = vld [vmem:[#allocation5 + $0x508] ss:$16 sps:$4 sm:$0xff]  }
  0xfc   :  { %2030 = vmatprep.subr.bf16.mxu1 %v3152_v13  ;;  %v3228_v13 = vld [vmem:[#allocation5 + $0x708] ss:$16 sps:$4 sm:$0xff]  }
  0xfd   :  { %1910 = vmatmul.mubr.bf16.gmra.mxu0 %v89_v22  ;;  %v3162_v22 = vld [vmem:[#allocation5 + $0x668] ss:$16 sps:$4 sm:$0xff]  }
  0xfe   :  { %1963 = vmatmul.mubr.bf16.gmra.mxu1 %v91_v23  ;;  %1978 = vmatpush1.bf16.msra.mxu0 %v3147_v16  ;;  %v3170_v23 = vld [vmem:[#allocation5 + $0x64c] ss:$16 sps:$4 sm:$0xff]  }
  0xff   :  { %2031 = vmatpush1.bf16.msra.mxu1 %v3150_v17  ;;  %1979 = vmatprep.subr.bf16.mxu0 %v3155_v8  ;;  %v3231_v16 = vld [vmem:[#allocation8 + $0x78] sm:$0xff]   ;;  %v3233_v8 = vld [vmem:[#allocation8 + $0x70] sm:$0xff]  }
 0x100   :  { %2032 = vmatprep.subr.bf16.mxu1 %v3158_v9  ;;  %2005 = vmatprep.mubr.bf16.mxu0 %v86_v41  ;;  %v3171_v41 = vld [vmem:[#allocation5 + $0x428] ss:$16 sps:$4 sm:$0xff]   ;;  %v3232_v17 = vld [vmem:[#allocation8 + $0x38] sm:$0xff]  }
 0x101   :  { %2058 = vmatprep.mubr.bf16.mxu1 %v88_v44  ;;  %v3174_v44 = vld [vmem:[#allocation5 + $0x628] ss:$16 sps:$4 sm:$0xff]  }
 0x102   :  { %1980 = vmatpush1.bf16.msra.mxu0 %v3153_v46  ;;  %v3234_v9 = vld [vmem:[#allocation8 + $0x30] sm:$0xff]   ;;  %v3235_v46 = vld [vmem:[#allocation8 + $0x68] sm:$0xff]  }
 0x103   :  { %2033 = vmatpush1.bf16.msra.mxu1 %v3156_v14  ;;  %1981 = vmatprep.subr.bf16.mxu0 %v3161_v50  ;;  %v3236_v14 = vld [vmem:[#allocation8 + $0x28] sm:$0xff]   ;;  %v3237_v50 = vld [vmem:[#allocation8 + $0x60] sm:$0xff]  }
 0x104   :  { %2034 = vmatprep.subr.bf16.mxu1 %v3164_v15  ;;  %v3240_v15 = vld [vmem:[#allocation8 + $0x18] sm:$0xff]  }
 0x106   :  { %1982 = vmatpush1.bf16.msra.mxu0 %v3159_v4  ;;  %v3241_v4 = vld [vmem:[#allocation8 + $0x50] sm:$0xff]  }
 0x107   :  { %2035 = vmatpush1.bf16.msra.mxu1 %v3162_v22  ;;  %1983 = vmatprep.subr.bf16.mxu0 %v3167_v5  ;;  %v3243_v22 = vld [vmem:[#allocation8 + $0x48] sm:$0xff]   ;;  %v3254_v5 = vld [vmem:[#allocation8 + $0xa0] sm:$0xff]  }
 0x108   :  { %2036 = vmatprep.subr.bf16.mxu1 %v3170_v23  ;;  %v3244_v23 = vld [vmem:[#allocation8 + $0x8] sm:$0xff]  }
 0x10a   :  { %1984 = vmatpush1.bf16.msra.mxu0 %v3165_v18  ;;  %v3245_v18 = vld [vmem:[#allocation8 + $0x40] sm:$0xff]  }
 0x10b   :  { %2037 = vmatpush1.bf16.msra.mxu1 %v3168_v19  ;;  %1985 = vmatprep.subr.bf16.mxu0 %v3173_v20  ;;  %v3246_v19 = vld [vmem:[#allocation8] sm:$0xff]  }
 0x10c   :  { %2038 = vmatprep.subr.bf16.mxu1 %v3176_v21 }
 0x10e   :  { %1986 = vmatpush1.bf16.msra.mxu0 %v3171_v41 }
 0x10f   :  { %2039 = vmatpush1.bf16.msra.mxu1 %v3174_v44  ;;  %1987 = vmatprep.subr.bf16.mxu0 %v3179_v24 }
 0x110   :  { %2040 = vmatprep.subr.bf16.mxu1 %v3182_v25 }
 0x112   :  { %1988 = vmatpush1.bf16.msra.mxu0 %v3177_v26  ;;  %v355_v26 = vlaneseq }
 0x113   :  { %2041 = vmatpush1.bf16.msra.mxu1 %v3180_v27  ;;  %1989 = vmatprep.subr.bf16.mxu0 %v3185_v30 }
 0x114   :  { %2042 = vmatprep.subr.bf16.mxu1 %v3188_v31  ;;  %v3520_v31 = vshrl.u32 %v355_v26, 7 }
 0x116   :  { %1990 = vmatpush2.bf16.msra.mxu0 %v3183_v34 }
 0x117   :  { %2043 = vmatpush2.bf16.msra.mxu1 %v3186_v35  ;;  %1991 = vmatprep.subr.bf16.mxu0 %v3191_v36  ;;  %v361_v36 = vsub.s32 1, %v3520_v31 }
 0x118   :  { %2044 = vmatprep.subr.bf16.mxu1 %v3194_v37  ;;  %v3523_v37 = vld [vmem:[#allocation7] sm:$0xf] }
 0x11a   :  { %1992 = vmatpush2.bf16.msra.mxu0 %v3189_v43  ;;  %v357_v43 = vsub.s32 0, %v3520_v31 }
 0x11b   :  { %2045 = vmatpush2.bf16.msra.mxu1 %v3192_v45  ;;  %1993 = vmatprep.subr.bf16.mxu0 %v3197_v47 }
 0x11c   :  { %2046 = vmatprep.subr.bf16.mxu1 %v3200_v48  ;;  %v362_v48 = vrot.slane %v3523_v37, %v361_v36 }
 0x11e   :  { %1994 = vmatpush2.bf16.msra.mxu0 %v3195_v53  ;;  %v358_v53 = vrot.slane %v3523_v37, %v357_v43 }
 0x11f   :  { %2047 = vmatpush2.bf16.msra.mxu1 %v3198_v54  ;;  %1995 = vmatprep.subr.bf16.mxu0 %v3203_v56 }
 0x120   :  { %2048 = vmatprep.subr.bf16.mxu1 %v3206_v57 }
 0x122   :  { %1996 = vmatpush2.bf16.msra.mxu0 %v3201_v58 }
 0x123   :  { %2049 = vmatpush2.bf16.msra.mxu1 %v3204_v59  ;;  %1997 = vmatprep.subr.bf16.mxu0 %v3209_v60 }
 0x124   :  { %2050 = vmatprep.subr.bf16.mxu1 %v3212_v61  ;;  %v3255_v61 = vld [vmem:[#allocation8 + $0xd8] sm:$0xff]  }
 0x126   :  { %1998 = vmatpush2.bf16.msra.mxu0 %v3207_v62 }
 0x127   :  { %2051 = vmatpush2.bf16.msra.mxu1 %v3210_v63  ;;  %1999 = vmatprep.subr.bf16.mxu0 %v3215_v0  ;;  %v3256_v63 = vld [vmem:[#allocation8 + $0x98] sm:$0xff]  }
 0x128   :  { %2052 = vmatprep.subr.bf16.mxu1 %v3218_v1 }
 0x12a   :  { %2000 = vmatpush2.bf16.msra.mxu0 %v3213_v2 }
 0x12b   :  { %2053 = vmatpush2.bf16.msra.mxu1 %v3216_v3  ;;  %2001 = vmatprep.subr.bf16.mxu0 %v3221_v6 }
 0x12c   :  { %2054 = vmatprep.subr.bf16.mxu1 %v3224_v7 }
 0x12e   :  { %2002 = vmatpush2.bf16.msra.mxu0 %v3219_v49 }
 0x12f   :  { %2055 = vmatpush2.bf16.msra.mxu1 %v3222_v10  ;;  %2003 = vmatprep.subr.bf16.mxu0 %v3227_v52  ;;  %v3257_v10 = vld [vmem:[#allocation8 + $0xd0] sm:$0xff]  }
 0x130   :  { %2056 = vmatprep.subr.bf16.mxu1 %v3230_v11 }
 0x132   :  { %2004 = vmatpush2.bf16.msra.mxu0 %v3225_v12  ;;  %v3258_v12 = vld [vmem:[#allocation8 + $0x90] sm:$0xff]  }
 0x133   :  { %2057 = vmatpush2.bf16.msra.mxu1 %v3228_v13  ;;  %2780 = vmatprep.subr.bf16.mxu0 %v3231_v16 }
 0x135   :  { %2006 = vmatmul.mubr.bf16.vlgmr.msra.gmra.mxu0 %v85_v32  ;;  %v3247_v32 = vld [vmem:[#allocation8 + $0xf8] sm:$0xff]   ;;  %v1689_v20 = vpop.f32.mrf.mxu0 }
 0x136   :  { %2059 = vmatmul.mubr.bf16.vlgmr.msra.gmra.mxu1 %v87_v33  ;;  %2015 = vmatprep.mubr.bf16.mxu0 %v94_v39  ;;  %v3238_v33 = vld [vmem:[#allocation8 + $0x20] sm:$0xff]   ;;  %v3249_v39 = vld [vmem:[#allocation8 + $0xf0] sm:$0xff]   ;;  %v1742_v21 = vpop.f32.mrf.mxu1  ;;  %v1690_v58 = vadd.f32 %v1689_v20, %v358_v53 }
 0x137   :  { %2068 = vmatprep.mubr.bf16.mxu1 %v96_v40  ;;  %2781 = vmatpush3.bf16.msra.mxu0 %v3232_v17  ;;  %v3250_v40 = vld [vmem:[#allocation8 + $0xb0] sm:$0xff]   ;;  %v1691_v41 = vpop.f32.mrf.mxu0  ;;  %v3261_v20 = vld [vmem:[#allocation8 + $0xc0] sm:$0xff]  }
 0x138   :  { %2782 = vmatprep.subr.bf16.mxu0 %v3233_v8  ;;  %2808 = vmatprep.subr.bf16.mxu1 %v3247_v32  ;;  %v1744_v44 = vpop.f32.mrf.mxu1  ;;  %v1692_v57 = vadd.f32 %v1691_v41, %v362_v48  ;;  %v1743_v6 = vadd.f32 %v1742_v21, %v1690_v58 }
 0x139   :  { %2809 = vmatpush3.bf16.msra.mxu1 %v3248_v38  ;;  %v1693_v24 = vpop.f32.mrf.mxu0  ;;  %v3259_v38 = vld [vmem:[#allocation8 + $0xc8] sm:$0xff]  }
 0x13a   :  { %2810 = vmatprep.subr.bf16.mxu1 %v3249_v39  ;;  %v1746_v25 = vpop.f32.mrf.mxu1  ;;  %v1694_v62 = vadd.f32 %v1693_v24, %v358_v53  ;;  %v1745_v2 = vadd.f32 %v1744_v44, %v1692_v57 }
 0x13b   :  { %2783 = vmatpush3.bf16.msra.mxu0 %v3234_v9  ;;  %v1695_v27 = vpop.f32.mrf.mxu0 }
 0x13c   :  { %2784 = vmatprep.subr.bf16.mxu0 %v3235_v46  ;;  %v1748_v30 = vpop.f32.mrf.mxu1  ;;  %v1696_v3 = vadd.f32 %v1695_v27, %v362_v48  ;;  %v1747_v52 = vadd.f32 %v1746_v25, %v1694_v62  ;;  %v3262_v25 = vld [vmem:[#allocation8 + $0x80] sm:$0xff]  }
 0x13d   :  { %2016 = vmatmul.mubr.bf16.gmra.mxu0 %v93_v51  ;;  %2811 = vmatpush3.bf16.msra.mxu1 %v3250_v40  ;;  %v3252_v51 = vld [vmem:[#allocation8 + $0xa8] sm:$0xff]   ;;  %v1699_v34 = vpop.f32.mrf.mxu0 }
 0x13e   :  { %2069 = vmatmul.mubr.bf16.gmra.mxu1 %v95_v55  ;;  %2812 = vmatprep.subr.bf16.mxu1 %v3251_v28  ;;  %v3242_v55 = vld [vmem:[#allocation8 + $0x10] sm:$0xff]   ;;  %v1752_v35 = vpop.f32.mrf.mxu1  ;;  %v1749_v8 = vadd.f32 %v1748_v30, %v1696_v3 }
 0x13f   :  { %2785 = vmatpush3.bf16.msra.mxu0 %v3236_v14  ;;  %v1701_v45 = vpop.f32.mrf.mxu0  ;;  %v1700_v14 = vadd.f32 %v1699_v34, %v358_v53 }
 0x140   :  { %2786 = vmatprep.subr.bf16.mxu0 %v3237_v50  ;;  %v1754_v47 = vpop.f32.mrf.mxu1  ;;  %v1702_v9 = vadd.f32 %v1701_v45, %v362_v48 }
 0x141   :  { %2813 = vmatpush3.bf16.msra.mxu1 %v3252_v51  ;;  %v1703_v54 = vpop.f32.mrf.mxu0 }
 0x142   :  { %2814 = vmatprep.subr.bf16.mxu1 %v3253_v29  ;;  %v1756_v56 = vpop.f32.mrf.mxu1  ;;  %v1755_v29 = vadd.f32 %v1754_v47, %v1702_v9 }
 0x143   :  { %2787 = vmatpush3.bf16.msra.mxu0 %v3238_v33  ;;  %v1705_v59 = vpop.f32.mrf.mxu0  ;;  %v1704_v33 = vadd.f32 %v1703_v54, %v358_v53 }
 0x144   :  { %2788 = vmatprep.subr.bf16.mxu0 %v3239_v42  ;;  %v1758_v60 = vpop.f32.mrf.mxu1 }
 0x145   :  { %2815 = vmatpush3.bf16.msra.mxu1 %v3254_v5  ;;  %v1753_v5 = vadd.f32 %v1752_v35, %v1700_v14  ;;  %v1757_v21 = vadd.f32 %v1756_v56, %v1704_v33 }
 0x146   :  { %2816 = vmatprep.subr.bf16.mxu1 %v3255_v61 }
 0x147   :  { %2789 = vmatpush3.bf16.msra.mxu0 %v3240_v15  ;;  %v3260_v15 = vld [vmem:[#allocation8 + $0x88] sm:$0xff]  }
 0x148   :  { %2790 = vmatprep.subr.bf16.mxu0 %v3241_v4 }
 0x149   :  { %2817 = vmatpush3.bf16.msra.mxu1 %v3256_v63 }
 0x14a   :  { %2818 = vmatprep.subr.bf16.mxu1 %v3257_v10 }
 0x14b   :  { %2791 = vmatpush3.bf16.msra.mxu0 %v3242_v55  ;;  %v1706_v55 = vadd.f32 %v1705_v59, %v362_v48 }
 0x14c   :  { %2792 = vmatprep.subr.bf16.mxu0 %v3243_v22 }
 0x14d   :  { %2819 = vmatpush3.bf16.msra.mxu1 %v3258_v12  ;;  %v1759_v36 = vadd.f32 %v1758_v60, %v1706_v55 }
 0x14e   :  { %2820 = vmatprep.subr.bf16.mxu1 %v3259_v38 }
 0x14f   :  { %2793 = vmatpush3.bf16.msra.mxu0 %v3244_v23 }
 0x150   :  { %2794 = vmatprep.subr.bf16.mxu0 %v3245_v18 }
 0x151   :  { %2821 = vmatpush3.bf16.msra.mxu1 %v3260_v15 }
 0x152   :  { %2822 = vmatprep.subr.bf16.mxu1 %v3261_v20 }
 0x153   :  { %2795 = vmatpush3.bf16.msra.mxu0 %v3246_v19 }
 0x155   :  { %2823 = vmatpush3.bf16.msra.mxu1 %v3262_v25 }
 0x175   :  { %v1795_v0 = vpop.f32.mrf.mxu0 }
 0x176   :  { %v1848_v1 = vpop.f32.mrf.mxu1  ;;  %v1796_v13 = vadd.f32 %v1795_v0, %v1743_v6 }
 0x177   :  { %v1797_v7 = vpop.f32.mrf.mxu0 }
 0x178   :  { %v1850_v49 = vpop.f32.mrf.mxu1  ;;  %v1798_v11 = vadd.f32 %v1797_v7, %v1745_v2  ;;  %v1849_v4 = vadd.f32 %v1848_v1, %v1796_v13  ;;  %v369_v13 = vsub.s32 3, %v3520_v31 }
 0x179   :  { %v1799_v16 = vpop.f32.mrf.mxu0 }
 0x17a   :  { %v1852_v17 = vpop.f32.mrf.mxu1  ;;  %v1800_v46 = vadd.f32 %v1799_v16, %v1747_v52  ;;  %v1851_v42 = vadd.f32 %v1850_v49, %v1798_v11  ;;  %v2079_v26 = vmax.f32 %v1849_v4, 0.0  ;;  %v365_v16 = vsub.s32 2, %v3520_v31 }
 0x17b   :  { %v1801_v50 = vpop.f32.mrf.mxu0  ;;  %v370_v9 = vrot.slane %v3523_v37, %v369_v13 }
 0x17c   :  { %v1854_v32 = vpop.f32.mrf.mxu1  ;;  %v1853_v39 = vadd.f32 %v1852_v17, %v1800_v46  ;;  %v1802_v40 = vadd.f32 %v1801_v50, %v1749_v8  ;;  %v2080_v41 = vmax.f32 %v1851_v42, 0.0  ;;  %v366_v46 = vrot.slane %v3523_v37, %v365_v16 }
 0x17d   :  { %v1805_v28 = vpop.f32.mrf.mxu0 }
 0x17e   :  { %v1858_v51 = vpop.f32.mrf.mxu1  ;;  %v1855_v22 = vadd.f32 %v1854_v32, %v1802_v40  ;;  %v2083_v23 = vmax.f32 %v1853_v39, 0.0  ;;  %v1806_v27 = vadd.f32 %v1805_v28, %v1753_v5 }
 0x17f   :  { %v1807_v18 = vpop.f32.mrf.mxu0 }
 0x180   :  { %v1860_v19 = vpop.f32.mrf.mxu1  ;;  %v2084_v44 = vmax.f32 %v1855_v22, 0.0  ;;  %v1808_v24 = vadd.f32 %v1807_v18, %v1755_v29  ;;  %v2095_v47 = vpack.c.bf16 %v2083_v23, %v2079_v26  ;;  %v1859_v56 = vadd.f32 %v1858_v51, %v1806_v27 }
 0x181   :  { %v1809_v30 = vpop.f32.mrf.mxu0 }
 0x182   :  { %v1862_v34 = vpop.f32.mrf.mxu1  ;;  %v2096_v43 = vpack.c.bf16 %v2084_v44, %v2080_v41  ;;  %v1810_v45 = vadd.f32 %v1809_v30, %v1757_v21  ;;  %v1861_v53 = vadd.f32 %v1860_v19, %v1808_v24  ;;  %v2087_v63 = vmax.f32 %v1859_v56, 0.0 }
 0x183   :  { %v1811_v35 = vpop.f32.mrf.mxu0 }
 0x184   :  { %v1864_v48 = vpop.f32.mrf.mxu1  ;;  %v1812_v54 = vadd.f32 %v1811_v35, %v1759_v36  ;;  %v1863_v57 = vadd.f32 %v1862_v34, %v1810_v45  ;;  %2398 = vmatprep.mubr.bf16.mxu0 %v2096_v43  ;;  %v2088_v61 = vmax.f32 %v1861_v53, 0.0 }
 0x185   :  { %2399 = vmatmul.mubr.bf16.vlgmr.msra.gmra.mxu0 %v2095_v47 }
 0x186   :  { %v1865_v58 = vadd.f32 %v1864_v48, %v1812_v54  ;;  %v2091_v59 = vmax.f32 %v1863_v57, 0.0 }
 0x188   :  { %v2092_v62 = vmax.f32 %v1865_v58, 0.0  ;;  %v2099_v1 = vpack.c.bf16 %v2091_v59, %v2087_v63 }
 0x18a   :  { %v2100_v0 = vpack.c.bf16 %v2092_v62, %v2088_v61 }
 0x18c   :  { %2406 = vmatprep.mubr.bf16.mxu0 %v2100_v0 }
 0x18d   :  { %2407 = vmatmul.mubr.bf16.gmra.mxu0 %v2099_v1 }
 0x1b5   :  { %v1901_v60 = vpop.f32.mrf.mxu0 }
 0x1b6   :  { %v1954_v2 = vpop.f32.mrf.mxu1  ;;  %v1902_v38 = vadd.f32 %v1901_v60, %v366_v46 }
 0x1b7   :  { %v1903_v3 = vpop.f32.mrf.mxu0 }
 0x1b8   :  { %v1956_v6 = vpop.f32.mrf.mxu1  ;;  %v1904_v32 = vadd.f32 %v1903_v3, %v370_v9  ;;  %v1955_v51 = vadd.f32 %v1954_v2, %v1902_v38 }
 0x1b9   :  { %v1905_v7 = vpop.f32.mrf.mxu0 }
 0x1ba   :  { %v1958_v49 = vpop.f32.mrf.mxu1  ;;  %v1906_v39 = vadd.f32 %v1905_v7, %v366_v46  ;;  %v1957_v4 = vadd.f32 %v1956_v6, %v1904_v32 }
 0x1bb   :  { %v1907_v10 = vpop.f32.mrf.mxu0 }
 0x1bc   :  { %v1960_v52 = vpop.f32.mrf.mxu1  ;;  %v1908_v28 = vadd.f32 %v1907_v10, %v370_v9  ;;  %v1959_v55 = vadd.f32 %v1958_v49, %v1906_v39  ;;  %v2747_v39 = vld [vmem:[%s3542_s4] ss:$0 sm:$0xff]  ;;  %s3379_s4 = smov [#allocation10]  }
 0x1bd   :  { %v1911_v11 = vpop.f32.mrf.mxu0  ;;  %s2477_s15 = sshll.u32 %s3379_s4, 4  ;;  %s2478_s15 = int_to_ptr.vmem [resolvable:$true] %s2477_s15 }
 0x1be   :  { %v1964_v12 = vpop.f32.mrf.mxu1  ;;  %v1961_v37 = vadd.f32 %v1960_v52, %v1908_v28  ;;  %v1912_v21 = vadd.f32 %v1911_v11, %v366_v46  ;;  %s3343_s16 = scalar_lea.vmem %s2478_s15, 512  ;;  %p3348_p7 = scmp.lt.s32.totalorder %s2478_s15, %s2478_s15 }
 0x1bf   :  { %v1913_v17 = vpop.f32.mrf.mxu0  ;;  %p3344_p6 = scmp.ne.s32.totalorder %s2478_s15, %s3343_s16  ;;  %p3349_p8 = scmp.lt.s32.totalorder %s3343_s16, %s3343_s16 }
 0x1c0   :  { %v1966_v8 = vpop.f32.mrf.mxu1  ;;  %v1914_v19 = vadd.f32 %v1913_v17, %v370_v9  ;;  %v1965_v35 = vadd.f32 %v1964_v12, %v1912_v21 }
 0x1c1   :  { %v1915_v14 = vpop.f32.mrf.mxu0  ;;  %p3350_p9 = por %p3349_p8, %p3348_p7 }
 0x1c2   :  { %v1968_v50 = vpop.f32.mrf.mxu1  ;;  %v1916_v24 = vadd.f32 %v1915_v14, %v366_v46  ;;  %v1967_v43 = vadd.f32 %v1966_v8, %v1914_v19 }
 0x1c3   :  { %v1917_v33 = vpop.f32.mrf.mxu0  ;;  %p3351_p10 = pnand %p3350_p9, %p3344_p6 }
 0x1c4   :  { %v1970_v42 = vpop.f32.mrf.mxu1  ;;  %v1918_v45 = vadd.f32 %v1917_v33, %v370_v9  ;;  %v1969_v57 = vadd.f32 %v1968_v50, %v1916_v24 }
 0x1c6   :  { %v1971_v1 = vadd.f32 %v1970_v42, %v1918_v45 }
 0x1f5   :  { %v2007_v40 = vpop.f32.mrf.mxu0 }
 0x1f6   :  { %v2060_v15 = vpop.f32.mrf.mxu1  ;;  %v2008_v5 = vadd.f32 %v2007_v40, %v1955_v51 }
 0x1f7   :  { %v2009_v29 = vpop.f32.mrf.mxu0 }
 0x1f8   :  { %v2062_v31 = vpop.f32.mrf.mxu1  ;;  %v2010_v22 = vadd.f32 %v2009_v29, %v1957_v4  ;;  %v2061_v30 = vadd.f32 %v2060_v15, %v2008_v5 }
 0x1f9   :  { %v2011_v23 = vpop.f32.mrf.mxu0 }
 0x1fa   :  { %v2064_v18 = vpop.f32.mrf.mxu1  ;;  %v2012_v20 = vadd.f32 %v2011_v23, %v1959_v55  ;;  %v2063_v25 = vadd.f32 %v2062_v31, %v2010_v22  ;;  %v2081_v61 = vmax.f32 %v2061_v30, 0.0 }
 0x1fb   :  { %v2013_v41 = vpop.f32.mrf.mxu0 }
 0x1fc   :  { %v2066_v44 = vpop.f32.mrf.mxu1  ;;  %v2065_v26 = vadd.f32 %v2064_v18, %v2012_v20  ;;  %v2014_v27 = vadd.f32 %v2013_v41, %v1961_v37  ;;  %v2082_v56 = vmax.f32 %v2063_v25, 0.0 }
 0x1fd   :  { %v2017_v34 = vpop.f32.mrf.mxu0 }
 0x1fe   :  { %v2070_v36 = vpop.f32.mrf.mxu1  ;;  %v2067_v47 = vadd.f32 %v2066_v44, %v2014_v27  ;;  %v2085_v48 = vmax.f32 %v2065_v26, 0.0  ;;  %v2018_v62 = vadd.f32 %v2017_v34, %v1965_v35 }
 0x1ff   :  { %v2019_v53 = vpop.f32.mrf.mxu0 }
 0x200   :  { %v2072_v54 = vpop.f32.mrf.mxu1  ;;  %v2086_v58 = vmax.f32 %v2067_v47, 0.0  ;;  %v2020_v59 = vadd.f32 %v2019_v53, %v1967_v43  ;;  %v2097_v3 = vpack.c.bf16 %v2085_v48, %v2081_v61  ;;  %v2071_v52 = vadd.f32 %v2070_v36, %v2018_v62 }
 0x201   :  { %v2021_v63 = vpop.f32.mrf.mxu0 }
 0x202   :  { %v2074_v0 = vpop.f32.mrf.mxu1  ;;  %v2098_v60 = vpack.c.bf16 %v2086_v58, %v2082_v56  ;;  %v2022_v2 = vadd.f32 %v2021_v63, %v1969_v57  ;;  %v2073_v7 = vadd.f32 %v2072_v54, %v2020_v59  ;;  %v2089_v8 = vmax.f32 %v2071_v52, 0.0 }
 0x203   :  { %v2023_v6 = vpop.f32.mrf.mxu0 }
 0x204   :  { %v2075_v49 = vadd.f32 %v2074_v0, %v2022_v2  ;;  %v2024_v10 = vadd.f32 %v2023_v6, %v1971_v1  ;;  %2447 = vmatprep.mubr.bf16.mxu1 %v2098_v60  ;;  %v2076_v11 = vpop.f32.mrf.mxu1  ;;  %v2090_v16 = vmax.f32 %v2073_v7, 0.0 }
 0x205   :  { %2448 = vmatmul.mubr.bf16.vlgmr.msra.gmra.mxu1 %v2097_v3 }
 0x206   :  { %v2077_v12 = vadd.f32 %v2076_v11, %v2024_v10  ;;  %v2093_v13 = vmax.f32 %v2075_v49, 0.0 }
 0x208   :  { %v2094_v17 = vmax.f32 %v2077_v12, 0.0  ;;  %v2101_v46 = vpack.c.bf16 %v2093_v13, %v2089_v8 }
 0x20a   :  { %v2102_v9 = vpack.c.bf16 %v2094_v17, %v2090_v16 }
 0x20c   :  { %2455 = vmatprep.mubr.bf16.mxu1 %v2102_v9 }
 0x20d   :  { %2456 = vmatmul.mubr.bf16.gmra.mxu1 %v2101_v46 }
 0x245   :  { %v2796_v14 = vpop.f32.mrf.mxu0 }
 0x247   :  { %v2797_v50 = vpop.f32.mrf.mxu0 }
 0x248   :  { %v2798_v42 = vadd.f32 %v2797_v50, %v2796_v14 }
 0x249   :  { %v2799_v32 = vpop.f32.mrf.mxu0 }
 0x24a   :  { %v2401_v28 = vadd.f32 %v2798_v42, %v2747_v39 }
 0x24b   :  { %v2800_v38 = vpop.f32.mrf.mxu0 }
 0x24c   :  { %v2801_v51 = vadd.f32 %v2800_v38, %v2799_v32 }
 0x24d   :  { %v2802_v33 = vpop.f32.mrf.mxu0 }
 0x24e   :  { %v2404_v23 = vadd.f32 %v2801_v51, %v2747_v39 }
 0x24f   :  { %v2803_v40 = vpop.f32.mrf.mxu0 }
 0x250   :  { %v2804_v18 = vadd.f32 %v2803_v40, %v2802_v33 }
 0x251   :  { %v2805_v31 = vpop.f32.mrf.mxu0 }
 0x252   :  { %v2409_v24 = vadd.f32 %v2804_v18, %v2747_v39 }
 0x253   :  { %v2806_v20 = vpop.f32.mrf.mxu0 }
 0x254   :  { %v2807_v25 = vadd.f32 %v2806_v20, %v2805_v31 }
 0x256   :  { %v2412_v43 = vadd.f32 %v2807_v25, %v2747_v39 }
 0x2c5   :  { %v2824_v15 = vpop.f32.mrf.mxu1 }
 0x2c7   :  { %v2825_v4 = vpop.f32.mrf.mxu1 }
 0x2c8   :  { %v2826_v29 = vadd.f32 %v2825_v4, %v2824_v15 }
 0x2c9   :  { %v2827_v55 = vpop.f32.mrf.mxu1 }
 0x2ca   :  { %v2450_v22 = vadd.f32 %v2826_v29, %v2401_v28 }
 0x2cb   :  { %v2828_v5 = vpop.f32.mrf.mxu1 }
 0x2cc   :  { %v2464_v37 = vmax.f32 %v2450_v22, 0.0  ;;  %v2829_v19 = vadd.f32 %v2828_v5, %v2827_v55 }
 0x2cd   :  { %v2830_v21 = vpop.f32.mrf.mxu1 }
 0x2ce   :  { %2468 = vst [vmem:[#allocation10] sm:$0xff] %v2464_v37  ;;  %v2453_v41 = vadd.f32 %v2829_v19, %v2404_v23 }
 0x2cf   :  { %v2831_v44 = vpop.f32.mrf.mxu1 }
 0x2d0   :  { %v2465_v26 = vmax.f32 %v2453_v41, 0.0  ;;  %v2832_v27 = vadd.f32 %v2831_v44, %v2830_v21 }
 0x2d1   :  { %v2833_v30 = vpop.f32.mrf.mxu1 }
 0x2d2   :  { %2469 = vst [vmem:[#allocation10 + $0x8] sm:$0xff] %v2465_v26  ;;  %v2458_v34 = vadd.f32 %v2832_v27, %v2409_v24 }
 0x2d3   :  { %v2834_v36 = vpop.f32.mrf.mxu1 }
 0x2d4   :  { %v2466_v45 = vmax.f32 %v2458_v34, 0.0  ;;  %v2835_v47 = vadd.f32 %v2834_v36, %v2833_v30 }
 0x2d6   :  { %2470 = vst [vmem:[#allocation10 + $0x10] sm:$0xff] %v2466_v45  ;;  %v2461_v35 = vadd.f32 %v2835_v47, %v2412_v43 }
 0x2d8   :  { %v2467_v48 = vmax.f32 %v2461_v35, 0.0 }
 0x2da   :  { %2471 = vst [vmem:[#allocation10 + $0x18] sm:$0xff] %v2467_v48 }
 0x2db   :  { %3354 = shalt.err (!%p3351_p10)
}
 0x2dc   :  { %s3380_s17 = smov 128   ;;  %s3381_s18 = smov 8  }
 0x2dd   :  { %2483 = dma.vmem_to_hbm [thread:$0]  %s2478_s15, 512, %s3543_s5, [#allocation4], %s3380_s17, %s3380_s17, %s3381_s18  }
 0x2de   :  { %3369 = dma.done.wait [#allocation4], 512  }
 0x2df   :  { %3370 = vsyncadd [#allocation4], 4294966784 }
 0x2e0   :  { %2487 = vsyncpa [#allocation3], 1 }
 0x2e1   :  { %2488 = vsyncpa [#allocation6], 1 }
 0x2e2   :  { %2489 = vsyncpa [#allocation9], 1 }
 0x2e3   :  { %2490 = vsyncpa [#allocation4], 1 }

</bundles_post_ra>
